<compile_context>
chip_gen: v6e
topology: v6e:2x2x1
jax: 0.10.0
libtpu: 0.0.40
codegen_flags: <defaults>
</compile_context>

<pallas_src>
import numpy as np
import jax
import jax.numpy as jnp
from jax.experimental import pallas as pl
from jax.experimental.pallas import tpu as pltpu

IN_FEATURES = 7 * (20 + 1)   # 147
IN_PAD = 256                 # 147 padded up to the next lane-aligned (x128) width
HIDDEN = 512
ACT_DIM = 7
HEAD_PAD = 128               # fused head cols: [mu(7) | sigma(7) | value(1) | zeros]
SIGMA_MIN = 1e-4
TB_CAP = 1024                # max batch-tile rows per grid step
TB_ALIGN = 16                # bf16 native sublane tile


def _acnet_kernel(obs_ref,
                  w0_ref, b0_ref,
                  w1_ref, b1_ref,
                  w2_ref, b2_ref,
                  w3_ref, b3_ref,
                  wh_ref, bh_ref,
                  out_ref):
    bf16 = jnp.bfloat16
    f32 = jnp.float32

    # Trunk: bf16 MXU matmuls with f32 accumulation; bias-add + ReLU epilogue in
    # bf16 so the stored inter-layer activations are bf16 end-to-end.
    h = obs_ref[...]                                           # bf16 [TB, 256]
    h = jnp.maximum(
        jnp.dot(h, w0_ref[...], preferred_element_type=f32).astype(bf16)
        + b0_ref[...], 0)
    h = jnp.maximum(
        jnp.dot(h, w1_ref[...], preferred_element_type=f32).astype(bf16)
        + b1_ref[...], 0)
    h = jnp.maximum(
        jnp.dot(h, w2_ref[...], preferred_element_type=f32).astype(bf16)
        + b2_ref[...], 0)
    h = jnp.maximum(
        jnp.dot(h, w3_ref[...], preferred_element_type=f32).astype(bf16)
        + b3_ref[...], 0)

    # Fused head: one lane-dense [TB, 128] matmul + unmasked store replaces three
    # N=7/7/1 matmuls and masked partial stores. The 2.0 sigma and -100.0 value
    # scales are folded into wh/bh host-side; only the post-scale sigma clamp on
    # columns [7, 14) remains (matches torch.clamp(2 * pi_sigma(h), min=1e-4)).
    raw = jnp.dot(h, wh_ref[...], preferred_element_type=f32) + bh_ref[...]
    col = jax.lax.broadcasted_iota(jnp.int32, raw.shape, 1)
    is_sigma = jnp.logical_and(col >= ACT_DIM, col < 2 * ACT_DIM)
    out_ref[...] = jnp.where(is_sigma, jnp.maximum(raw, SIGMA_MIN), raw)


def _round_up(x, m):
    return (x + m - 1) // m * m


def _batch_tile(B):
    """Rows per grid step.

    Guarantees >= 2 grid steps once B > TB_ALIGN so dimension_semantics=
    ("parallel",) can shard the batch across v7x's two TensorCores, while capping
    the tile at TB_CAP rows so each step still amortizes per-step pipeline
    overhead on single-TC chips (v5e/v6e).
    """
    half = _round_up(max(-(-B // 2), 1), TB_ALIGN)
    return min(TB_CAP, half)


def actor_critic_forward(obs, packed):
    """obs: [B, 147]. Returns (mean [B,7], covMat [B,7,7], value [B])."""
    w0, b0, w1, b1, w2, b2, w3, b3, wh, bh = packed
    B = obs.shape[0]
    TB = _batch_tile(B)
    B_pad = _round_up(B, TB)

    # Cast to bf16 + zero-pad in one fused XLA op: halves the obs DMA and removes
    # the in-kernel cast.
    obs_p = jnp.pad(obs.astype(jnp.bfloat16),
                    ((0, B_pad - B), (0, IN_PAD - IN_FEATURES)))

    const = lambda i: (0, 0)  # weights/biases: fetched once, VMEM-resident
    out = pl.pallas_call(
        _acnet_kernel,
        out_shape=jax.ShapeDtypeStruct((B_pad, HEAD_PAD), jnp.float32),
        grid=(B_pad // TB,),
        in_specs=[
            pl.BlockSpec((TB, IN_PAD), lambda i: (i, 0)),
            pl.BlockSpec((IN_PAD, HIDDEN), const), pl.BlockSpec((1, HIDDEN), const),
            pl.BlockSpec((HIDDEN, HIDDEN), const), pl.BlockSpec((1, HIDDEN), const),
            pl.BlockSpec((HIDDEN, HIDDEN), const), pl.BlockSpec((1, HIDDEN), const),
            pl.BlockSpec((HIDDEN, HIDDEN), const), pl.BlockSpec((1, HIDDEN), const),
            pl.BlockSpec((HIDDEN, HEAD_PAD), const), pl.BlockSpec((1, HEAD_PAD), const),
        ],
        out_specs=pl.BlockSpec((TB, HEAD_PAD), lambda i: (i, 0)),
        compiler_params=pltpu.CompilerParams(
            dimension_semantics=("parallel",),
            vmem_limit_bytes=32 * 1024 * 1024),
    )(obs_p, w0, b0, w1, b1, w2, b2, w3, b3, wh, bh)

    out = out[:B]
    mean = out[:, :ACT_DIM]
    sigma = out[:, ACT_DIM:2 * ACT_DIM]
    value = out[:, 2 * ACT_DIM]
    # covMat = diag(sigma), exactly as the PyTorch module builds it (sigma on the
    # diagonal — not sigma**2).
    cov_mat = sigma[:, :, None] * jnp.eye(ACT_DIM, dtype=sigma.dtype)[None, :, :]
    # TODO(synk): the MultivariateNormal distribution object and the in-forward
    # print have no Pallas equivalent; we return the distribution parameters
    # (mean, covMat) plus value instead of (pi, value).
    return mean, cov_mat, value


def _init_linear(key, in_f, out_f, gain):
    """Torch-like init: orthogonal W [out, in], uniform bias [out]."""
    kw, kb = jax.random.split(key)
    w = jax.nn.initializers.orthogonal(scale=gain)(kw, (out_f, in_f), jnp.float32)
    bound = 1.0 / np.sqrt(in_f)
    b = jax.random.uniform(kb, (out_f,), jnp.float32, minval=-bound, maxval=bound)
    return w, b


def make_params(key):
    gain = float(np.sqrt(2.0))
    sizes = [
        (IN_FEATURES, HIDDEN),  # input
        (HIDDEN, HIDDEN),       # hidden1
        (HIDDEN, HIDDEN),       # hidden2
        (HIDDEN, HIDDEN),       # hidden3
        (HIDDEN, ACT_DIM),      # pi_raw
        (HIDDEN, ACT_DIM),      # pi_sigma
        (HIDDEN, 1),            # value
    ]
    keys = jax.random.split(key, len(sizes))
    return [_init_linear(k, i, o, gain) for k, (i, o) in zip(keys, sizes)]


def pack_params(layers):
    """Pre-transpose to [in, out], zero-pad w0 rows 147->256, fuse the three heads
    (folding the 2.0 / -100.0 scales), cast matmul weights and trunk biases to bf16.
    The fused-head bias stays f32 (head epilogue runs in f32)."""
    (w0, b0), (w1, b1), (w2, b2), (w3, b3), (wmu, bmu), (wsg, bsg), (wv, bv) = layers
    bf = jnp.bfloat16

    w0p = jnp.zeros((IN_PAD, HIDDEN), jnp.float32).at[:IN_FEATURES, :].set(w0.T)

    wh = jnp.zeros((HIDDEN, HEAD_PAD), jnp.float32)
    wh = wh.at[:, 0:ACT_DIM].set(wmu.T)
    wh = wh.at[:, ACT_DIM:2 * ACT_DIM].set(2.0 * wsg.T)
    wh = wh.at[:, 2 * ACT_DIM:2 * ACT_DIM + 1].set(-100.0 * wv.T)

    bh = jnp.zeros((1, HEAD_PAD), jnp.float32)
    bh = bh.at[0, 0:ACT_DIM].set(bmu)
    bh = bh.at[0, ACT_DIM:2 * ACT_DIM].set(2.0 * bsg)
    bh = bh.at[0, 2 * ACT_DIM].set(-100.0 * bv[0])

    return (w0p.astype(bf), b0.reshape(1, -1).astype(bf),
            w1.T.astype(bf), b1.reshape(1, -1).astype(bf),
            w2.T.astype(bf), b2.reshape(1, -1).astype(bf),
            w3.T.astype(bf), b3.reshape(1, -1).astype(bf),
            wh.astype(bf), bh)


def _reference_forward_packed(obs, packed):
    """Pure-JAX reference mirroring the kernel math exactly (same bf16 params)."""
    w0, b0, w1, b1, w2, b2, w3, b3, wh, bh = packed
    bf, f32 = jnp.bfloat16, jnp.float32
    x = jnp.pad(obs.astype(bf), ((0, 0), (0, IN_PAD - IN_FEATURES)))
    h = jnp.maximum(jnp.dot(x, w0, preferred_element_type=f32).astype(bf) + b0, 0)
    h = jnp.maximum(jnp.dot(h, w1, preferred_element_type=f32).astype(bf) + b1, 0)
    h = jnp.maximum(jnp.dot(h, w2, preferred_element_type=f32).astype(bf) + b2, 0)
    h = jnp.maximum(jnp.dot(h, w3, preferred_element_type=f32).astype(bf) + b3, 0)
    raw = jnp.dot(h, wh, preferred_element_type=f32) + bh
    mean = raw[:, :ACT_DIM]
    sigma = jnp.maximum(raw[:, ACT_DIM:2 * ACT_DIM], SIGMA_MIN)
    value = raw[:, 2 * ACT_DIM]
    cov = sigma[:, :, None] * jnp.eye(ACT_DIM, dtype=sigma.dtype)[None, :, :]
    return mean, cov, value


def _reference_forward_f32(obs, layers):
    """Full-precision reference of the original PyTorch module (fidelity check)."""
    (w0, b0), (w1, b1), (w2, b2), (w3, b3), (wmu, bmu), (wsg, bsg), (wv, bv) = layers
    h = jax.nn.relu(obs @ w0.T + b0)
    h = jax.nn.relu(h @ w1.T + b1)
    h = jax.nn.relu(h @ w2.T + b2)
    h = jax.nn.relu(h @ w3.T + b3)
    mean = h @ wmu.T + bmu
    sigma = jnp.maximum(2.0 * (h @ wsg.T + bsg), SIGMA_MIN)
    value = -100.0 * (h @ wv.T + bv).reshape(-1)
    cov = sigma[:, :, None] * jnp.eye(ACT_DIM, dtype=sigma.dtype)[None, :, :]
    return mean, cov, value


if __name__ == "__main__":
    key = jax.random.PRNGKey(0)
    k_obs, k_params = jax.random.split(key)

    B = 2
    obs = jax.random.normal(k_obs, (B, IN_FEATURES), dtype=jnp.float32)
    layers = make_params(k_params)
    packed = pack_params(layers)

    mean, cov_mat, value = actor_critic_forward(obs, packed)
    jax.block_until_ready((mean, cov_mat, value))

    # Tight check: kernel vs pure-JAX reference running identical bf16 math.
    rm, rc, rv = _reference_forward_packed(obs, packed)
    np.testing.assert_allclose(np.asarray(mean), np.asarray(rm), rtol=2e-3, atol=2e-3)
    np.testing.assert_allclose(np.asarray(cov_mat), np.asarray(rc), rtol=2e-3, atol=2e-3)
    np.testing.assert_allclose(np.asarray(value), np.asarray(rv), rtol=2e-3, atol=2e-3)

    # Loose sanity check of fidelity against the original f32 model (bf16
    # weights/activations introduce ~1% error; this catches structural mistakes
    # like wrong wiring or missing 2.0 / -100.0 scales, not rounding noise).
    fm, fc, fv = _reference_forward_f32(obs, layers)
    np.testing.assert_allclose(np.asarray(mean), np.asarray(fm), rtol=0.1, atol=0.3)
    np.testing.assert_allclose(np.asarray(cov_mat), np.asarray(fc), rtol=0.1, atol=0.3)
    np.testing.assert_allclose(np.asarray(value), np.asarray(fv), rtol=0.1, atol=30.0)

    print("KERNEL_OK")
</pallas_src>

<mosaic_0001>
module attributes {stable_mosaic.version = 11 : i64} {
  func.func @_acnet_kernel(%arg0: i32, %arg1: memref<16x256xbf16, #tpu.memory_space<vmem>>, %arg2: memref<256x512xbf16, #tpu.memory_space<vmem>>, %arg3: memref<1x512xbf16, #tpu.memory_space<vmem>>, %arg4: memref<512x512xbf16, #tpu.memory_space<vmem>>, %arg5: memref<1x512xbf16, #tpu.memory_space<vmem>>, %arg6: memref<512x512xbf16, #tpu.memory_space<vmem>>, %arg7: memref<1x512xbf16, #tpu.memory_space<vmem>>, %arg8: memref<512x512xbf16, #tpu.memory_space<vmem>>, %arg9: memref<1x512xbf16, #tpu.memory_space<vmem>>, %arg10: memref<512x128xbf16, #tpu.memory_space<vmem>>, %arg11: memref<1x128xf32, #tpu.memory_space<vmem>>, %arg12: memref<16x128xf32, #tpu.memory_space<vmem>>) attributes {dimension_semantics = [#tpu.dimension_semantics<parallel>], iteration_bounds = array<i64: 1>, scalar_prefetch = 0 : i64, scratch_operands = 0 : i64, tpu.core_type = #tpu.core_type<tc>, window_params = [{transform_indices = @transform_0, window_bounds = array<i64: 16, 256>}, {pipeline_mode = #tpu.pipeline_mode<synchronous>, transform_indices = @transform_1, window_bounds = array<i64: 256, 512>}, {pipeline_mode = #tpu.pipeline_mode<synchronous>, transform_indices = @transform_2, window_bounds = array<i64: 1, 512>}, {pipeline_mode = #tpu.pipeline_mode<synchronous>, transform_indices = @transform_3, window_bounds = array<i64: 512, 512>}, {pipeline_mode = #tpu.pipeline_mode<synchronous>, transform_indices = @transform_4, window_bounds = array<i64: 1, 512>}, {pipeline_mode = #tpu.pipeline_mode<synchronous>, transform_indices = @transform_5, window_bounds = array<i64: 512, 512>}, {pipeline_mode = #tpu.pipeline_mode<synchronous>, transform_indices = @transform_6, window_bounds = array<i64: 1, 512>}, {pipeline_mode = #tpu.pipeline_mode<synchronous>, transform_indices = @transform_7, window_bounds = array<i64: 512, 512>}, {pipeline_mode = #tpu.pipeline_mode<synchronous>, transform_indices = @transform_8, window_bounds = array<i64: 1, 512>}, {pipeline_mode = #tpu.pipeline_mode<synchronous>, transform_indices = @transform_9, window_bounds = array<i64: 512, 128>}, {pipeline_mode = #tpu.pipeline_mode<synchronous>, transform_indices = @transform_10, window_bounds = array<i64: 1, 128>}, {transform_indices = @transform_11, window_bounds = array<i64: 16, 128>}]} {
    %c0 = arith.constant 0 : index
    %c0_0 = arith.constant 0 : index
    %0 = vector.load %arg1[%c0, %c0_0] : memref<16x256xbf16, #tpu.memory_space<vmem>>, vector<16x256xbf16>
    %c0_1 = arith.constant 0 : index
    %c0_2 = arith.constant 0 : index
    %1 = vector.load %arg2[%c0_1, %c0_2] : memref<256x512xbf16, #tpu.memory_space<vmem>>, vector<256x512xbf16>
    %cst = arith.constant dense<0.000000e+00> : vector<16x512xf32>
    %2 = tpu.matmul %0, %1, %cst {dimension_numbers = #tpu.dot_dimension_numbers<[1], [0], [0], [1], [0, 0, 1, 1], [], []>} : vector<16x256xbf16>, vector<256x512xbf16>, vector<16x512xf32> -> vector<16x512xf32>
    %3 = arith.truncf %2 : vector<16x512xf32> to vector<16x512xbf16>
    %c0_3 = arith.constant 0 : index
    %c0_4 = arith.constant 0 : index
    %4 = vector.load %arg3[%c0_3, %c0_4] : memref<1x512xbf16, #tpu.memory_space<vmem>>, vector<1x512xbf16>
    %5 = vector.broadcast %4 : vector<1x512xbf16> to vector<16x512xbf16>
    %6 = arith.addf %3, %5 : vector<16x512xbf16>
    %cst_5 = arith.constant 0.000000e+00 : bf16
    %7 = vector.broadcast %cst_5 : bf16 to vector<16x512xbf16>
    %8 = arith.maximumf %6, %7 : vector<16x512xbf16>
    %c0_6 = arith.constant 0 : index
    %c0_7 = arith.constant 0 : index
    %9 = vector.load %arg4[%c0_6, %c0_7] : memref<512x512xbf16, #tpu.memory_space<vmem>>, vector<512x512xbf16>
    %cst_8 = arith.constant dense<0.000000e+00> : vector<16x512xf32>
    %10 = tpu.matmul %8, %9, %cst_8 {dimension_numbers = #tpu.dot_dimension_numbers<[1], [0], [0], [1], [0, 0, 1, 1], [], []>} : vector<16x512xbf16>, vector<512x512xbf16>, vector<16x512xf32> -> vector<16x512xf32>
    %11 = arith.truncf %10 : vector<16x512xf32> to vector<16x512xbf16>
    %c0_9 = arith.constant 0 : index
    %c0_10 = arith.constant 0 : index
    %12 = vector.load %arg5[%c0_9, %c0_10] : memref<1x512xbf16, #tpu.memory_space<vmem>>, vector<1x512xbf16>
    %13 = vector.broadcast %12 : vector<1x512xbf16> to vector<16x512xbf16>
    %14 = arith.addf %11, %13 : vector<16x512xbf16>
    %cst_11 = arith.constant 0.000000e+00 : bf16
    %15 = vector.broadcast %cst_11 : bf16 to vector<16x512xbf16>
    %16 = arith.maximumf %14, %15 : vector<16x512xbf16>
    %c0_12 = arith.constant 0 : index
    %c0_13 = arith.constant 0 : index
    %17 = vector.load %arg6[%c0_12, %c0_13] : memref<512x512xbf16, #tpu.memory_space<vmem>>, vector<512x512xbf16>
    %cst_14 = arith.constant dense<0.000000e+00> : vector<16x512xf32>
    %18 = tpu.matmul %16, %17, %cst_14 {dimension_numbers = #tpu.dot_dimension_numbers<[1], [0], [0], [1], [0, 0, 1, 1], [], []>} : vector<16x512xbf16>, vector<512x512xbf16>, vector<16x512xf32> -> vector<16x512xf32>
    %19 = arith.truncf %18 : vector<16x512xf32> to vector<16x512xbf16>
    %c0_15 = arith.constant 0 : index
    %c0_16 = arith.constant 0 : index
    %20 = vector.load %arg7[%c0_15, %c0_16] : memref<1x512xbf16, #tpu.memory_space<vmem>>, vector<1x512xbf16>
    %21 = vector.broadcast %20 : vector<1x512xbf16> to vector<16x512xbf16>
    %22 = arith.addf %19, %21 : vector<16x512xbf16>
    %cst_17 = arith.constant 0.000000e+00 : bf16
    %23 = vector.broadcast %cst_17 : bf16 to vector<16x512xbf16>
    %24 = arith.maximumf %22, %23 : vector<16x512xbf16>
    %c0_18 = arith.constant 0 : index
    %c0_19 = arith.constant 0 : index
    %25 = vector.load %arg8[%c0_18, %c0_19] : memref<512x512xbf16, #tpu.memory_space<vmem>>, vector<512x512xbf16>
    %cst_20 = arith.constant dense<0.000000e+00> : vector<16x512xf32>
    %26 = tpu.matmul %24, %25, %cst_20 {dimension_numbers = #tpu.dot_dimension_numbers<[1], [0], [0], [1], [0, 0, 1, 1], [], []>} : vector<16x512xbf16>, vector<512x512xbf16>, vector<16x512xf32> -> vector<16x512xf32>
    %27 = arith.truncf %26 : vector<16x512xf32> to vector<16x512xbf16>
    %c0_21 = arith.constant 0 : index
    %c0_22 = arith.constant 0 : index
    %28 = vector.load %arg9[%c0_21, %c0_22] : memref<1x512xbf16, #tpu.memory_space<vmem>>, vector<1x512xbf16>
    %29 = vector.broadcast %28 : vector<1x512xbf16> to vector<16x512xbf16>
    %30 = arith.addf %27, %29 : vector<16x512xbf16>
    %cst_23 = arith.constant 0.000000e+00 : bf16
    %31 = vector.broadcast %cst_23 : bf16 to vector<16x512xbf16>
    %32 = arith.maximumf %30, %31 : vector<16x512xbf16>
    %c0_24 = arith.constant 0 : index
    %c0_25 = arith.constant 0 : index
    %33 = vector.load %arg10[%c0_24, %c0_25] : memref<512x128xbf16, #tpu.memory_space<vmem>>, vector<512x128xbf16>
    %cst_26 = arith.constant dense<0.000000e+00> : vector<16x128xf32>
    %34 = tpu.matmul %32, %33, %cst_26 {dimension_numbers = #tpu.dot_dimension_numbers<[1], [0], [0], [1], [0, 0, 1, 1], [], []>} : vector<16x512xbf16>, vector<512x128xbf16>, vector<16x128xf32> -> vector<16x128xf32>
    %c0_27 = arith.constant 0 : index
    %c0_28 = arith.constant 0 : index
    %35 = vector.load %arg11[%c0_27, %c0_28] : memref<1x128xf32, #tpu.memory_space<vmem>>, vector<1x128xf32>
    %36 = vector.broadcast %35 : vector<1x128xf32> to vector<16x128xf32>
    %37 = arith.addf %34, %36 : vector<16x128xf32>
    %38 = tpu.iota {dimensions = array<i32: 1>} : vector<16x128xi32>
    %c7_i32 = arith.constant 7 : i32
    %39 = vector.broadcast %c7_i32 : i32 to vector<16x128xi32>
    %40 = arith.cmpi sge, %38, %39 : vector<16x128xi32>
    %c14_i32 = arith.constant 14 : i32
    %41 = vector.broadcast %c14_i32 : i32 to vector<16x128xi32>
    %42 = arith.cmpi slt, %38, %41 : vector<16x128xi32>
    %43 = arith.andi %40, %42 : vector<16x128xi1>
    %cst_29 = arith.constant 9.99999974E-5 : f32
    %44 = vector.broadcast %cst_29 : f32 to vector<16x128xf32>
    %45 = arith.maximumf %37, %44 : vector<16x128xf32>
    %46 = arith.select %43, %45, %37 : vector<16x128xi1>, vector<16x128xf32>
    %c0_30 = arith.constant 0 : index
    %c0_31 = arith.constant 0 : index
    %47 = vector.load %arg12[%c0_30, %c0_31] : memref<16x128xf32, #tpu.memory_space<vmem>>, vector<16x128xf32>
    tpu.vector_store %arg12[%c0_30, %c0_31], %46 {strides = array<i32>} : memref<16x128xf32, #tpu.memory_space<vmem>>, vector<16x128xf32>,
    return
  }
  func.func @transform_0(%arg0: i32) -> (i32, i32) {
    %c0_i32 = arith.constant 0 : i32
    %c0_i32_0 = arith.constant 0 : i32
    return %arg0, %c0_i32 : i32, i32
  }
  func.func @transform_1(%arg0: i32) -> (i32, i32) {
    %c0_i32 = arith.constant 0 : i32
    %c0_i32_0 = arith.constant 0 : i32
    %c0_i32_1 = arith.constant 0 : i32
    return %c0_i32, %c0_i32_0 : i32, i32
  }
  func.func @transform_2(%arg0: i32) -> (i32, i32) {
    %c0_i32 = arith.constant 0 : i32
    %c0_i32_0 = arith.constant 0 : i32
    %c0_i32_1 = arith.constant 0 : i32
    return %c0_i32, %c0_i32_0 : i32, i32
  }
  func.func @transform_3(%arg0: i32) -> (i32, i32) {
    %c0_i32 = arith.constant 0 : i32
    %c0_i32_0 = arith.constant 0 : i32
    %c0_i32_1 = arith.constant 0 : i32
    return %c0_i32, %c0_i32_0 : i32, i32
  }
  func.func @transform_4(%arg0: i32) -> (i32, i32) {
    %c0_i32 = arith.constant 0 : i32
    %c0_i32_0 = arith.constant 0 : i32
    %c0_i32_1 = arith.constant 0 : i32
    return %c0_i32, %c0_i32_0 : i32, i32
  }
  func.func @transform_5(%arg0: i32) -> (i32, i32) {
    %c0_i32 = arith.constant 0 : i32
    %c0_i32_0 = arith.constant 0 : i32
    %c0_i32_1 = arith.constant 0 : i32
    return %c0_i32, %c0_i32_0 : i32, i32
  }
  func.func @transform_6(%arg0: i32) -> (i32, i32) {
    %c0_i32 = arith.constant 0 : i32
    %c0_i32_0 = arith.constant 0 : i32
    %c0_i32_1 = arith.constant 0 : i32
    return %c0_i32, %c0_i32_0 : i32, i32
  }
  func.func @transform_7(%arg0: i32) -> (i32, i32) {
    %c0_i32 = arith.constant 0 : i32
    %c0_i32_0 = arith.constant 0 : i32
    %c0_i32_1 = arith.constant 0 : i32
    return %c0_i32, %c0_i32_0 : i32, i32
  }
  func.func @transform_8(%arg0: i32) -> (i32, i32) {
    %c0_i32 = arith.constant 0 : i32
    %c0_i32_0 = arith.constant 0 : i32
    %c0_i32_1 = arith.constant 0 : i32
    return %c0_i32, %c0_i32_0 : i32, i32
  }
  func.func @transform_9(%arg0: i32) -> (i32, i32) {
    %c0_i32 = arith.constant 0 : i32
    %c0_i32_0 = arith.constant 0 : i32
    %c0_i32_1 = arith.constant 0 : i32
    return %c0_i32, %c0_i32_0 : i32, i32
  }
  func.func @transform_10(%arg0: i32) -> (i32, i32) {
    %c0_i32 = arith.constant 0 : i32
    %c0_i32_0 = arith.constant 0 : i32
    %c0_i32_1 = arith.constant 0 : i32
    return %c0_i32, %c0_i32_0 : i32, i32
  }
  func.func @transform_11(%arg0: i32) -> (i32, i32) {
    %c0_i32 = arith.constant 0 : i32
    %c0_i32_0 = arith.constant 0 : i32
    return %arg0, %c0_i32 : i32, i32
  }
}

</mosaic_0001>

<bundles_post_ra>
// kernel: tpu_custom_call.1
= control target key start
LH: loop header
LB: loop body
LE: loop exit
PB: predicated region body
PF: predicated region fallthrough
CT: control target
= control target key end

     0   :  { %16 = vsyncpa [#allocation3], 0  ;;  %s5723_s0 = inlined_call_operand.hbm [shape: bf16[16,256], index: 0, kind: input, shape index: {}]   ;;  %s5724_s1 = inlined_call_operand.hbm [shape: bf16[256,512], index: 1, kind: input, shape index: {}]   ;;  %s5725_s2 = inlined_call_operand.hbm [shape: bf16[1,512], index: 2, kind: input, shape index: {}]   ;;  %s5726_s3 = inlined_call_operand.hbm [shape: bf16[512,512], index: 3, kind: input, shape index: {}]   ;;  %s5727_s4 = inlined_call_operand.vmem [shape: bf16[1,512], index: 4, kind: input, shape index: {}]   ;;  %s5728_s5 = inlined_call_operand.hbm [shape: bf16[512,512], index: 5, kind: input, shape index: {}]   ;;  %s5729_s6 = inlined_call_operand.vmem [shape: bf16[1,512], index: 6, kind: input, shape index: {}]   ;;  %s5730_s7 = inlined_call_operand.hbm [shape: bf16[512,512], index: 7, kind: input, shape index: {}]   ;;  %s5731_s8 = inlined_call_operand.vmem [shape: bf16[1,512], index: 8, kind: input, shape index: {}]   ;;  %s5732_s9 = inlined_call_operand.hbm [shape: bf16[512,128], index: 9, kind: input, shape index: {}]   ;;  %s5733_s10 = inlined_call_operand.vmem [shape: f32[1,128], index: 10, kind: input, shape index: {}]   ;;  %s5734_s11 = inlined_call_operand.hbm [shape: f32[16,128], index: 11, kind: output, shape index: {}]  }
   0x1   :  { %17 = vsyncpa [#allocation6], 0 }
   0x2   :  { %18 = vsyncpa [#allocation9], 0 }
   0x3   :  { %19 = vsyncpa [#allocation12], 0 }
   0x4   :  { %20 = vsyncpa [#allocation4], 0  ;;  %s5499_s17 = smov [#allocation5]  }
   0x5   :  { %s38_s18 = sshll.u32 %s5499_s17, 4  ;;  %s39_s18 = int_to_ptr.vmem [resolvable:$true] %s38_s18 }
   0x6   :  { %s5337_s19 = scalar_lea.vmem %s39_s18, 8192  ;;  %p5342_p1 = scmp.lt.s32.totalorder %s39_s18, %s39_s18 }
   0x7   :  { %p5338_p0 = scmp.ne.s32.totalorder %s39_s18, %s5337_s19  ;;  %p5343_p2 = scmp.lt.s32.totalorder %s5337_s19, %s5337_s19 }
   0x9   :  { %p5344_p3 = por %p5343_p2, %p5342_p1 }
   0xb   :  { %p5345_p4 = pnand %p5344_p3, %p5338_p0 }
   0xd   :  { %5348 = shalt.err (!%p5345_p4)
}
   0xe   :  { %s5500_s20 = smov 256   ;;  %s5501_s21 = smov 16  }
   0xf   :  { %44 = dma.hbm_to_vmem [thread:$0]  %s5724_s1, 8192, %s39_s18, [#allocation6], %s5500_s20, %s5500_s20, %s5501_s21  }
  0x10   :  { %s5502_s24 = smov [#allocation8]   ;;  %s5503_s26 = smov [#allocation11]  }
  0x11   :  { %s60_s25 = sshll.u32 %s5502_s24, 4  ;;  %s88_s27 = sshll.u32 %s5503_s26, 4  ;;  %s61_s25 = int_to_ptr.vmem [resolvable:$true] %s60_s25  ;;  %s89_s27 = int_to_ptr.vmem [resolvable:$true] %s88_s27 }
  0x12   :  { %s5357_s28 = scalar_lea.vmem %s61_s25, 16384  ;;  %p5362_p6 = scmp.lt.s32.totalorder %s61_s25, %s61_s25 }
  0x13   :  { %p5358_p5 = scmp.ne.s32.totalorder %s61_s25, %s5357_s28  ;;  %p5363_p7 = scmp.lt.s32.totalorder %s5357_s28, %s5357_s28 }
  0x15   :  { %p5364_p8 = por %p5363_p7, %p5362_p6 }
  0x17   :  { %p5365_p9 = pnand %p5364_p8, %p5358_p5 }
  0x19   :  { %5368 = shalt.err (!%p5365_p9)
}
  0x1a   :  { %66 = dma.hbm_to_vmem [thread:$0]  %s5726_s3, 16384, %s61_s25, [#allocation9], %s5500_s20, %s5500_s20, %s5501_s21  }
  0x1b   :  { %s5377_s1 = scalar_lea.vmem %s89_s27, 16384  ;;  %p5382_p11 = scmp.lt.s32.totalorder %s89_s27, %s89_s27 }
  0x1c   :  { %p5378_p10 = scmp.ne.s32.totalorder %s89_s27, %s5377_s1  ;;  %p5383_p12 = scmp.lt.s32.totalorder %s5377_s1, %s5377_s1 }
  0x1e   :  { %p5384_p13 = por %p5383_p12, %p5382_p11 }
  0x20   :  { %p5385_p0 = pnand %p5384_p13, %p5378_p10 }
  0x22   :  { %5388 = shalt.err (!%p5385_p0)
}
  0x23   :  { %94 = dma.hbm_to_vmem [thread:$0]  %s5730_s7, 16384, %s89_s27, [#allocation12], %s5500_s20, %s5500_s20, %s5501_s21  }
  0x24   :  { %s5504_s14 = smov [#allocation2]  }
  0x25   :  { %s26_s15 = sshll.u32 %s5504_s14, 4  ;;  %s27_s15 = int_to_ptr.vmem [resolvable:$true] %s26_s15 }
  0x26   :  { %s5397_s16 = scalar_lea.vmem %s27_s15, 256  ;;  %p5402_p2 = scmp.lt.s32.totalorder %s27_s15, %s27_s15 }
  0x27   :  { %p5398_p1 = scmp.ne.s32.totalorder %s27_s15, %s5397_s16  ;;  %p5403_p3 = scmp.lt.s32.totalorder %s5397_s16, %s5397_s16 }
  0x29   :  { %p5404_p4 = por %p5403_p3, %p5402_p2 }
  0x2b   :  { %p5405_p5 = pnand %p5404_p4, %p5398_p1 }
  0x2d   :  { %5408 = shalt.err (!%p5405_p5)
}
  0x2e   :  { %s5505_s3 = smov 128   ;;  %s5506_s17 = smov 8  }
  0x2f   :  { %32 = dma.hbm_to_vmem [thread:$0]  %s5723_s0, 256, %s27_s15, [#allocation3], %s5505_s3, %s5505_s3, %s5506_s17  }
  0x30   :  { %s5507_s7 = smov [#allocation7]   ;;  %s5508_s23 = smov [#allocation10]  }
  0x31   :  { %s51_s22 = sshll.u32 %s5507_s7, 4  ;;  %s74_s24 = sshll.u32 %s5508_s23, 4  ;;  %s52_s22 = int_to_ptr.vmem [resolvable:$true] %s51_s22  ;;  %s75_s24 = int_to_ptr.vmem [resolvable:$true] %s74_s24 }
  0x32   :  { %s5417_s25 = scalar_lea.vmem %s52_s22, 64  ;;  %p5422_p7 = scmp.lt.s32.totalorder %s52_s22, %s52_s22 }
  0x33   :  { %p5418_p6 = scmp.ne.s32.totalorder %s52_s22, %s5417_s25  ;;  %p5423_p8 = scmp.lt.s32.totalorder %s5417_s25, %s5417_s25 }
  0x35   :  { %p5424_p9 = por %p5423_p8, %p5422_p7 }
  0x37   :  { %p5425_p10 = pnand %p5424_p9, %p5418_p6 }
  0x39   :  { %5428 = shalt.err (!%p5425_p10)
}
  0x3a   :  { %54 = dma.hbm_to_vmem [thread:$0]  %s5725_s2, 64, %s52_s22, [#allocation6]  }
  0x3b   :  { %s5437_s28 = scalar_lea.vmem %s75_s24, 16384  ;;  %p5442_p12 = scmp.lt.s32.totalorder %s75_s24, %s75_s24 }
  0x3c   :  { %p5438_p11 = scmp.ne.s32.totalorder %s75_s24, %s5437_s28  ;;  %p5443_p13 = scmp.lt.s32.totalorder %s5437_s28, %s5437_s28 }
  0x3e   :  { %p5444_p0 = por %p5443_p13, %p5442_p12 }
  0x40   :  { %p5445_p1 = pnand %p5444_p0, %p5438_p11 }
  0x42   :  { %5448 = shalt.err (!%p5445_p1)
}
  0x43   :  { %80 = dma.hbm_to_vmem [thread:$0]  %s5728_s5, 16384, %s75_s24, [#allocation9], %s5500_s20, %s5500_s20, %s5501_s21  }
  0x44   :  { %s5509_s30 = smov [#allocation13]  }
  0x45   :  { %s102_s1 = sshll.u32 %s5509_s30, 4  ;;  %s103_s1 = int_to_ptr.vmem [resolvable:$true] %s102_s1 }
  0x46   :  { %s5457_s12 = scalar_lea.vmem %s103_s1, 4096  ;;  %p5462_p3 = scmp.lt.s32.totalorder %s103_s1, %s103_s1 }
  0x47   :  { %p5458_p2 = scmp.ne.s32.totalorder %s103_s1, %s5457_s12  ;;  %p5463_p4 = scmp.lt.s32.totalorder %s5457_s12, %s5457_s12 }
  0x49   :  { %p5464_p5 = por %p5463_p4, %p5462_p3 }
  0x4b   :  { %p5465_p6 = pnand %p5464_p5, %p5458_p2 }
  0x4d   :  { %5468 = shalt.err (!%p5465_p6)
}
  0x4e   :  { %s5510_s2 = smov 64   ;;  %s5511_s13 = smov 4  }
  0x4f   :  { %108 = dma.hbm_to_vmem [thread:$0]  %s5732_s9, 4096, %s103_s1, [#allocation12], %s5510_s2, %s5510_s2, %s5511_s13  }
  0x50   :  { %5489 = dma.done.wait [#allocation3], 256  }
  0x51   :  { %5490 = vsyncadd [#allocation3], 4294967040 }
  0x52   :  { %5491 = dma.done.wait [#allocation6], 8256  }
  0x53   :  { %5492 = vsyncadd [#allocation6], 4294959040 }
  0x54   :  { %5493 = dma.done.wait [#allocation9], 32768  }
  0x55   :  { %5494 = vsyncadd [#allocation9], 4294934528 }
  0x56   :  { %5495 = dma.done.wait [#allocation12], 20480  }
  0x57   :  { %5496 = vsyncadd [#allocation12], 4294946816  ;;  %v4622_v0 = vld [vmem:[#allocation5 + $0xe4] ss:$16 sps:$4 sm:$0xff]   ;;  %v4624_v1 = vld [vmem:[#allocation5 + $0xec] ss:$16 sps:$4 sm:$0xff]  }
  0x58   :  { %529 = vmatprep.subr.bf16.mxu0 %v4622_v0  ;;  %v4626_v2 = vld [vmem:[#allocation5 + $0xe0] ss:$16 sps:$4 sm:$0xff]   ;;  %v4627_v3 = vld [vmem:[#allocation5 + $0xe8] ss:$16 sps:$4 sm:$0xff]   ;;  %572 = vmatprep.subr.bf16.mxu1 %v4624_v1  ;;  %v4628_v4 = vld [vmem:[#allocation5 + $0xc4] ss:$16 sps:$4 sm:$0xff]  }
  0x59   :  { %530 = vmatpush1.bf16.msra.mxu0 %v4626_v2  ;;  %573 = vmatpush1.bf16.msra.mxu1 %v4627_v3  ;;  %v4630_v5 = vld [vmem:[#allocation5 + $0xcc] ss:$16 sps:$4 sm:$0xff]   ;;  %v4632_v6 = vld [vmem:[#allocation5 + $0xc0] ss:$16 sps:$4 sm:$0xff]   ;;  %v4633_v7 = vld [vmem:[#allocation5 + $0xc8] ss:$16 sps:$4 sm:$0xff]  }
  0x5a   :  { %531 = vmatprep.subr.bf16.mxu0 %v4628_v4  ;;  %574 = vmatprep.subr.bf16.mxu1 %v4630_v5  ;;  %v4634_v8 = vld [vmem:[#allocation5 + $0xa4] ss:$16 sps:$4 sm:$0xff]   ;;  %v4636_v9 = vld [vmem:[#allocation5 + $0xac] ss:$16 sps:$4 sm:$0xff]   ;;  %v4638_v10 = vld [vmem:[#allocation5 + $0xa0] ss:$16 sps:$4 sm:$0xff]  }
  0x5b   :  { %v4639_v11 = vld [vmem:[#allocation5 + $0xa8] ss:$16 sps:$4 sm:$0xff]   ;;  %v4640_v12 = vld [vmem:[#allocation5 + $0x84] ss:$16 sps:$4 sm:$0xff]   ;;  %v4642_v13 = vld [vmem:[#allocation5 + $0x8c] ss:$16 sps:$4 sm:$0xff]  }
  0x5c   :  { %v4644_v14 = vld [vmem:[#allocation5 + $0x80] ss:$16 sps:$4 sm:$0xff]   ;;  %v4645_v15 = vld [vmem:[#allocation5 + $0x88] ss:$16 sps:$4 sm:$0xff]   ;;  %v4646_v16 = vld [vmem:[#allocation5 + $0x64] ss:$16 sps:$4 sm:$0xff]  }
  0x5d   :  { %532 = vmatpush1.bf16.msra.mxu0 %v4632_v6  ;;  %575 = vmatpush1.bf16.msra.mxu1 %v4633_v7  ;;  %v4648_v17 = vld [vmem:[#allocation5 + $0x6c] ss:$16 sps:$4 sm:$0xff]   ;;  %v4650_v18 = vld [vmem:[#allocation5 + $0x60] ss:$16 sps:$4 sm:$0xff]   ;;  %v4651_v19 = vld [vmem:[#allocation5 + $0x68] ss:$16 sps:$4 sm:$0xff]  }
  0x5e   :  { %533 = vmatprep.subr.bf16.mxu0 %v4634_v8  ;;  %576 = vmatprep.subr.bf16.mxu1 %v4636_v9  ;;  %v4652_v20 = vld [vmem:[#allocation5 + $0x44] ss:$16 sps:$4 sm:$0xff]   ;;  %v4654_v21 = vld [vmem:[#allocation5 + $0x4c] ss:$16 sps:$4 sm:$0xff]   ;;  %v4656_v22 = vld [vmem:[#allocation5 + $0x40] ss:$16 sps:$4 sm:$0xff]  }
  0x5f   :  { %v4657_v23 = vld [vmem:[#allocation5 + $0x48] ss:$16 sps:$4 sm:$0xff]   ;;  %v4658_v24 = vld [vmem:[#allocation5 + $0x24] ss:$16 sps:$4 sm:$0xff]   ;;  %v4660_v25 = vld [vmem:[#allocation5 + $0x2c] ss:$16 sps:$4 sm:$0xff]  }
  0x60   :  { %v4662_v26 = vld [vmem:[#allocation5 + $0x20] ss:$16 sps:$4 sm:$0xff]   ;;  %v4663_v27 = vld [vmem:[#allocation5 + $0x28] ss:$16 sps:$4 sm:$0xff]   ;;  %v4664_v28 = vld [vmem:[#allocation5 + $0x4] ss:$16 sps:$4 sm:$0xff]  }
  0x61   :  { %534 = vmatpush1.bf16.msra.mxu0 %v4638_v10  ;;  %577 = vmatpush1.bf16.msra.mxu1 %v4639_v11  ;;  %v4666_v29 = vld [vmem:[#allocation5 + $0xc] ss:$16 sps:$4 sm:$0xff]   ;;  %v4668_v30 = vld [vmem:[#allocation5] ss:$16 sps:$4 sm:$0xff]   ;;  %v4669_v31 = vld [vmem:[#allocation5 + $0x8] ss:$16 sps:$4 sm:$0xff]  }
  0x62   :  { %535 = vmatprep.subr.bf16.mxu0 %v4640_v12  ;;  %578 = vmatprep.subr.bf16.mxu1 %v4642_v13  ;;  %v4670_v32 = vld [vmem:[#allocation5 + $0x1e4] ss:$16 sps:$4 sm:$0xff]   ;;  %v4672_v33 = vld [vmem:[#allocation5 + $0x1ec] ss:$16 sps:$4 sm:$0xff]   ;;  %v4674_v34 = vld [vmem:[#allocation5 + $0x1e0] ss:$16 sps:$4 sm:$0xff]  }
  0x63   :  { %v4675_v35 = vld [vmem:[#allocation5 + $0x1e8] ss:$16 sps:$4 sm:$0xff]   ;;  %v4676_v36 = vld [vmem:[#allocation5 + $0x1c4] ss:$16 sps:$4 sm:$0xff]   ;;  %v4678_v37 = vld [vmem:[#allocation5 + $0x1cc] ss:$16 sps:$4 sm:$0xff]  }
  0x64   :  { %v4680_v38 = vld [vmem:[#allocation5 + $0x1c0] ss:$16 sps:$4 sm:$0xff]   ;;  %v4681_v39 = vld [vmem:[#allocation5 + $0x1c8] ss:$16 sps:$4 sm:$0xff]   ;;  %v4682_v40 = vld [vmem:[#allocation5 + $0x1a4] ss:$16 sps:$4 sm:$0xff]  }
  0x65   :  { %536 = vmatpush1.bf16.msra.mxu0 %v4644_v14  ;;  %579 = vmatpush1.bf16.msra.mxu1 %v4645_v15  ;;  %v4684_v41 = vld [vmem:[#allocation5 + $0x1ac] ss:$16 sps:$4 sm:$0xff]   ;;  %v4686_v42 = vld [vmem:[#allocation5 + $0x1a0] ss:$16 sps:$4 sm:$0xff]   ;;  %v4687_v43 = vld [vmem:[#allocation5 + $0x1a8] ss:$16 sps:$4 sm:$0xff]  }
  0x66   :  { %537 = vmatprep.subr.bf16.mxu0 %v4646_v16  ;;  %580 = vmatprep.subr.bf16.mxu1 %v4648_v17  ;;  %v4688_v44 = vld [vmem:[#allocation5 + $0x184] ss:$16 sps:$4 sm:$0xff]   ;;  %v4690_v45 = vld [vmem:[#allocation5 + $0x18c] ss:$16 sps:$4 sm:$0xff]   ;;  %v4692_v46 = vld [vmem:[#allocation5 + $0x180] ss:$16 sps:$4 sm:$0xff]  }
  0x67   :  { %v4693_v47 = vld [vmem:[#allocation5 + $0x188] ss:$16 sps:$4 sm:$0xff]   ;;  %v4720_v48 = vld [vmem:[#allocation2 + $0x4] ss:$8 sps:$4 sm:$0xff]   ;;  %v4698_v51 = vld [vmem:[#allocation5 + $0x160] ss:$16 sps:$4 sm:$0xff]  }
  0x68   :  { %v4694_v49 = vld [vmem:[#allocation5 + $0x164] ss:$16 sps:$4 sm:$0xff]   ;;  %v4696_v50 = vld [vmem:[#allocation5 + $0x16c] ss:$16 sps:$4 sm:$0xff]   ;;  %561 = vmatprep.mubr.bf16.mxu0 %v4720_v48  ;;  %604 = vmatprep.mubr.bf16.mxu1 %v4720_v48  ;;  %v4699_v52 = vld [vmem:[#allocation5 + $0x168] ss:$16 sps:$4 sm:$0xff]  }
  0x69   :  { %538 = vmatpush1.bf16.msra.mxu0 %v4650_v18  ;;  %581 = vmatpush1.bf16.msra.mxu1 %v4651_v19  ;;  %v4700_v53 = vld [vmem:[#allocation5 + $0x144] ss:$16 sps:$4 sm:$0xff]   ;;  %v4702_v54 = vld [vmem:[#allocation5 + $0x14c] ss:$16 sps:$4 sm:$0xff]   ;;  %v4704_v55 = vld [vmem:[#allocation5 + $0x140] ss:$16 sps:$4 sm:$0xff]  }
  0x6a   :  { %539 = vmatprep.subr.bf16.mxu0 %v4652_v20  ;;  %582 = vmatprep.subr.bf16.mxu1 %v4654_v21  ;;  %v4705_v56 = vld [vmem:[#allocation5 + $0x148] ss:$16 sps:$4 sm:$0xff]   ;;  %v4706_v57 = vld [vmem:[#allocation5 + $0x124] ss:$16 sps:$4 sm:$0xff]   ;;  %v4708_v58 = vld [vmem:[#allocation5 + $0x12c] ss:$16 sps:$4 sm:$0xff]  }
  0x6b   :  { %v4710_v59 = vld [vmem:[#allocation5 + $0x120] ss:$16 sps:$4 sm:$0xff]   ;;  %v4711_v60 = vld [vmem:[#allocation5 + $0x128] ss:$16 sps:$4 sm:$0xff]   ;;  %v4712_v61 = vld [vmem:[#allocation5 + $0x104] ss:$16 sps:$4 sm:$0xff]  }
  0x6c   :  { %v4714_v62 = vld [vmem:[#allocation5 + $0x10c] ss:$16 sps:$4 sm:$0xff]   ;;  %v4716_v63 = vld [vmem:[#allocation5 + $0x100] ss:$16 sps:$4 sm:$0xff]   ;;  %v4717_v0 = vld [vmem:[#allocation5 + $0x108] ss:$16 sps:$4 sm:$0xff]  }
  0x6d   :  { %540 = vmatpush1.bf16.msra.mxu0 %v4656_v22  ;;  %583 = vmatpush1.bf16.msra.mxu1 %v4657_v23  ;;  %v4723_v1 = vld [vmem:[#allocation8 + $0xe4] ss:$16 sps:$4 sm:$0xff]   ;;  %v4721_v4 = vld [vmem:[#allocation8 + $0xe0] ss:$16 sps:$4 sm:$0xff]   ;;  %s5514_s18 = smov [#allocation14]  }
  0x6e   :  { %541 = vmatprep.subr.bf16.mxu0 %v4658_v24  ;;  %584 = vmatprep.subr.bf16.mxu1 %v4660_v25  ;;  %v4726_v2 = vld [vmem:[#allocation8 + $0x2e4] ss:$16 sps:$4 sm:$0xff]   ;;  %v4724_v5 = vld [vmem:[#allocation8 + $0x2e0] ss:$16 sps:$4 sm:$0xff]   ;;  %s4060_s19 = sshll.u32 %s5514_s18, 4  ;;  %s4061_s19 = int_to_ptr.vmem [resolvable:$true] %s4060_s19 }
  0x6f   :  { %v4718_v3 = vld [vmem:[#allocation2] ss:$8 sps:$4 sm:$0xff]   ;;  %v4727_v8 = vld [vmem:[#allocation8 + $0xc0] ss:$16 sps:$4 sm:$0xff]   ;;  %p5474_p8 = scmp.lt.s32.totalorder %s4061_s19, %s4061_s19 }
  0x70   :  { %v4729_v6 = vld [vmem:[#allocation8 + $0xc4] ss:$16 sps:$4 sm:$0xff]   ;;  %v4730_v9 = vld [vmem:[#allocation8 + $0x2c0] ss:$16 sps:$4 sm:$0xff]  }
  0x71   :  { %542 = vmatpush1.bf16.msra.mxu0 %v4662_v26  ;;  %585 = vmatpush1.bf16.msra.mxu1 %v4663_v27  ;;  %v4732_v7 = vld [vmem:[#allocation8 + $0x2c4] ss:$16 sps:$4 sm:$0xff]   ;;  %v4733_v12 = vld [vmem:[#allocation8 + $0xa0] ss:$16 sps:$4 sm:$0xff]  }
  0x72   :  { %543 = vmatprep.subr.bf16.mxu0 %v4664_v28  ;;  %586 = vmatprep.subr.bf16.mxu1 %v4666_v29  ;;  %v4735_v10 = vld [vmem:[#allocation8 + $0xa4] ss:$16 sps:$4 sm:$0xff]   ;;  %v4736_v13 = vld [vmem:[#allocation8 + $0x2a0] ss:$16 sps:$4 sm:$0xff]  }
  0x73   :  { %v4738_v11 = vld [vmem:[#allocation8 + $0x2a4] ss:$16 sps:$4 sm:$0xff]   ;;  %v4739_v16 = vld [vmem:[#allocation8 + $0x80] ss:$16 sps:$4 sm:$0xff]  }
  0x74   :  { %v4741_v14 = vld [vmem:[#allocation8 + $0x84] ss:$16 sps:$4 sm:$0xff]   ;;  %v4742_v17 = vld [vmem:[#allocation8 + $0x280] ss:$16 sps:$4 sm:$0xff]  }
  0x75   :  { %544 = vmatpush1.bf16.msra.mxu0 %v4668_v30  ;;  %587 = vmatpush1.bf16.msra.mxu1 %v4669_v31  ;;  %v4744_v15 = vld [vmem:[#allocation8 + $0x284] ss:$16 sps:$4 sm:$0xff]   ;;  %v4745_v20 = vld [vmem:[#allocation8 + $0x60] ss:$16 sps:$4 sm:$0xff]  }
  0x76   :  { %545 = vmatprep.subr.bf16.mxu0 %v4670_v32  ;;  %588 = vmatprep.subr.bf16.mxu1 %v4672_v33  ;;  %v4747_v18 = vld [vmem:[#allocation8 + $0x64] ss:$16 sps:$4 sm:$0xff]   ;;  %v4748_v21 = vld [vmem:[#allocation8 + $0x260] ss:$16 sps:$4 sm:$0xff]  }
  0x77   :  { %v4750_v19 = vld [vmem:[#allocation8 + $0x264] ss:$16 sps:$4 sm:$0xff]   ;;  %v4751_v24 = vld [vmem:[#allocation8 + $0x40] ss:$16 sps:$4 sm:$0xff]  }
  0x78   :  { %v4753_v22 = vld [vmem:[#allocation8 + $0x44] ss:$16 sps:$4 sm:$0xff]   ;;  %v4754_v25 = vld [vmem:[#allocation8 + $0x240] ss:$16 sps:$4 sm:$0xff]  }
  0x79   :  { %546 = vmatpush2.bf16.msra.mxu0 %v4674_v34  ;;  %589 = vmatpush2.bf16.msra.mxu1 %v4675_v35  ;;  %v4756_v23 = vld [vmem:[#allocation8 + $0x244] ss:$16 sps:$4 sm:$0xff]   ;;  %v4757_v28 = vld [vmem:[#allocation8 + $0x20] ss:$16 sps:$4 sm:$0xff]  }
  0x7a   :  { %547 = vmatprep.subr.bf16.mxu0 %v4676_v36  ;;  %590 = vmatprep.subr.bf16.mxu1 %v4678_v37  ;;  %v4759_v26 = vld [vmem:[#allocation8 + $0x24] ss:$16 sps:$4 sm:$0xff]   ;;  %v4760_v29 = vld [vmem:[#allocation8 + $0x220] ss:$16 sps:$4 sm:$0xff]  }
  0x7b   :  { %v4762_v27 = vld [vmem:[#allocation8 + $0x224] ss:$16 sps:$4 sm:$0xff]   ;;  %v4763_v32 = vld [vmem:[#allocation8] ss:$16 sps:$4 sm:$0xff]  }
  0x7c   :  { %v4765_v30 = vld [vmem:[#allocation8 + $0x4] ss:$16 sps:$4 sm:$0xff]   ;;  %v4766_v33 = vld [vmem:[#allocation8 + $0x200] ss:$16 sps:$4 sm:$0xff]  }
  0x7d   :  { %548 = vmatpush2.bf16.msra.mxu0 %v4680_v38  ;;  %591 = vmatpush2.bf16.msra.mxu1 %v4681_v39  ;;  %v4768_v31 = vld [vmem:[#allocation8 + $0x204] ss:$16 sps:$4 sm:$0xff]   ;;  %v4769_v36 = vld [vmem:[#allocation8 + $0x1e0] ss:$16 sps:$4 sm:$0xff]  }
  0x7e   :  { %549 = vmatprep.subr.bf16.mxu0 %v4682_v40  ;;  %592 = vmatprep.subr.bf16.mxu1 %v4684_v41  ;;  %v4771_v34 = vld [vmem:[#allocation8 + $0x1e4] ss:$16 sps:$4 sm:$0xff]   ;;  %v4772_v37 = vld [vmem:[#allocation8 + $0x3e0] ss:$16 sps:$4 sm:$0xff]  }
  0x7f   :  { %v4774_v35 = vld [vmem:[#allocation8 + $0x3e4] ss:$16 sps:$4 sm:$0xff]   ;;  %v4775_v40 = vld [vmem:[#allocation8 + $0x1c0] ss:$16 sps:$4 sm:$0xff]  }
  0x80   :  { %v4777_v38 = vld [vmem:[#allocation8 + $0x1c4] ss:$16 sps:$4 sm:$0xff]   ;;  %v4778_v41 = vld [vmem:[#allocation8 + $0x3c0] ss:$16 sps:$4 sm:$0xff]  }
  0x81   :  { %550 = vmatpush2.bf16.msra.mxu0 %v4686_v42  ;;  %593 = vmatpush2.bf16.msra.mxu1 %v4687_v43  ;;  %v4780_v39 = vld [vmem:[#allocation8 + $0x3c4] ss:$16 sps:$4 sm:$0xff]   ;;  %v4787_v48 = vld [vmem:[#allocation8 + $0x180] ss:$16 sps:$4 sm:$0xff]  }
  0x82   :  { %551 = vmatprep.subr.bf16.mxu0 %v4688_v44  ;;  %594 = vmatprep.subr.bf16.mxu1 %v4690_v45  ;;  %v4783_v42 = vld [vmem:[#allocation8 + $0x1a4] ss:$16 sps:$4 sm:$0xff]   ;;  %v4781_v44 = vld [vmem:[#allocation8 + $0x1a0] ss:$16 sps:$4 sm:$0xff]  }
  0x83   :  { %v4786_v43 = vld [vmem:[#allocation8 + $0x3a4] ss:$16 sps:$4 sm:$0xff]   ;;  %v4784_v45 = vld [vmem:[#allocation8 + $0x3a0] ss:$16 sps:$4 sm:$0xff]  }
  0x85   :  { %552 = vmatpush2.bf16.msra.mxu0 %v4692_v46  ;;  %595 = vmatpush2.bf16.msra.mxu1 %v4693_v47  ;;  %v4789_v46 = vld [vmem:[#allocation8 + $0x184] ss:$16 sps:$4 sm:$0xff]  }
  0x86   :  { %553 = vmatprep.subr.bf16.mxu0 %v4694_v49  ;;  %596 = vmatprep.subr.bf16.mxu1 %v4696_v50  ;;  %v4792_v47 = vld [vmem:[#allocation8 + $0x384] ss:$16 sps:$4 sm:$0xff]   ;;  %v4790_v49 = vld [vmem:[#allocation8 + $0x380] ss:$16 sps:$4 sm:$0xff]  }
  0x87   :  { %v4795_v50 = vld [vmem:[#allocation8 + $0x164] ss:$16 sps:$4 sm:$0xff]  }
  0x89   :  { %554 = vmatpush2.bf16.msra.mxu0 %v4698_v51  ;;  %597 = vmatpush2.bf16.msra.mxu1 %v4699_v52  ;;  %v4798_v51 = vld [vmem:[#allocation8 + $0x364] ss:$16 sps:$4 sm:$0xff]   ;;  %v4793_v52 = vld [vmem:[#allocation8 + $0x160] ss:$16 sps:$4 sm:$0xff]  }
  0x8a   :  { %555 = vmatprep.subr.bf16.mxu0 %v4700_v53  ;;  %598 = vmatprep.subr.bf16.mxu1 %v4702_v54  ;;  %v4796_v53 = vld [vmem:[#allocation8 + $0x360] ss:$16 sps:$4 sm:$0xff]   ;;  %v4801_v54 = vld [vmem:[#allocation8 + $0x144] ss:$16 sps:$4 sm:$0xff]  }
  0x8d   :  { %556 = vmatpush2.bf16.msra.mxu0 %v4704_v55  ;;  %599 = vmatpush2.bf16.msra.mxu1 %v4705_v56  ;;  %v4804_v55 = vld [vmem:[#allocation8 + $0x344] ss:$16 sps:$4 sm:$0xff]   ;;  %v4799_v56 = vld [vmem:[#allocation8 + $0x140] ss:$16 sps:$4 sm:$0xff]  }
  0x8e   :  { %557 = vmatprep.subr.bf16.mxu0 %v4706_v57  ;;  %600 = vmatprep.subr.bf16.mxu1 %v4708_v58  ;;  %v4802_v57 = vld [vmem:[#allocation8 + $0x340] ss:$16 sps:$4 sm:$0xff]   ;;  %v4807_v58 = vld [vmem:[#allocation8 + $0x124] ss:$16 sps:$4 sm:$0xff]  }
  0x91   :  { %558 = vmatpush2.bf16.msra.mxu0 %v4710_v59  ;;  %601 = vmatpush2.bf16.msra.mxu1 %v4711_v60  ;;  %v4810_v59 = vld [vmem:[#allocation8 + $0x324] ss:$16 sps:$4 sm:$0xff]   ;;  %v4805_v60 = vld [vmem:[#allocation8 + $0x120] ss:$16 sps:$4 sm:$0xff]  }
  0x92   :  { %559 = vmatprep.subr.bf16.mxu0 %v4712_v61  ;;  %602 = vmatprep.subr.bf16.mxu1 %v4714_v62  ;;  %v4808_v61 = vld [vmem:[#allocation8 + $0x320] ss:$16 sps:$4 sm:$0xff]   ;;  %v4813_v62 = vld [vmem:[#allocation8 + $0x104] ss:$16 sps:$4 sm:$0xff]  }
  0x95   :  { %560 = vmatpush2.bf16.msra.mxu0 %v4716_v63  ;;  %603 = vmatpush2.bf16.msra.mxu1 %v4717_v0  ;;  %v4816_v63 = vld [vmem:[#allocation8 + $0x304] ss:$16 sps:$4 sm:$0xff]   ;;  %v4811_v0 = vld [vmem:[#allocation8 + $0x100] ss:$16 sps:$4 sm:$0xff]  }
  0x96   :  { %1449 = vmatprep.subr.bf16.mxu0 %v4723_v1  ;;  %1492 = vmatprep.subr.bf16.mxu1 %v4726_v2  ;;  %v4814_v1 = vld [vmem:[#allocation8 + $0x300] ss:$16 sps:$4 sm:$0xff]   ;;  %v4819_v2 = vld [vmem:[#allocation8 + $0xec] ss:$16 sps:$4 sm:$0xff]  }
  0x98   :  { %562 = vmatmul.mubr.bf16.vlgmr.msra.gmra.mxu0 %v4718_v3  ;;  %605 = vmatmul.mubr.bf16.vlgmr.msra.gmra.mxu1 %v4718_v3  ;;  %v4822_v3 = vld [vmem:[#allocation8 + $0x2ec] ss:$16 sps:$4 sm:$0xff]  }
  0x99   :  { %1450 = vmatpush1.bf16.msra.mxu0 %v4721_v4  ;;  %1493 = vmatpush1.bf16.msra.mxu1 %v4724_v5  ;;  %v5512_v4 = vmov 1966171168  }
  0x9a   :  { %1451 = vmatprep.subr.bf16.mxu0 %v4729_v6  ;;  %1494 = vmatprep.subr.bf16.mxu1 %v4732_v7  ;;  %v630_v5 = vunpack.c.l.s4 %v5512_v4  ;;  %v632_v6 = vlaneseq  ;;  %v4855_v4 = vld [vmem:[#allocation8 + $0x2c] ss:$16 sps:$4 sm:$0xff]  }
  0x9c   :  { %v631_v7 = vunpack.c.0.s8 %v630_v5  ;;  %v4858_v5 = vld [vmem:[#allocation8 + $0x22c] ss:$16 sps:$4 sm:$0xff]  }
  0x9d   :  { %1452 = vmatpush1.bf16.msra.mxu0 %v4727_v8  ;;  %1495 = vmatpush1.bf16.msra.mxu1 %v4730_v9  ;;  %v633_v8 = vshrl.u32 %v632_v6, 7  ;;  %v4141_v9 = vld.sshfl [vmem:[#allocation7] sm:$0x33 pattern:$0x75316420] }
  0x9e   :  { %1453 = vmatprep.subr.bf16.mxu0 %v4735_v10  ;;  %1496 = vmatprep.subr.bf16.mxu1 %v4738_v11  ;;  %v628_v11 = vcombine.high %v4141_v9, %v4141_v9 }
  0x9f   :  { %v5612_v10 = vsub.s32 %v631_v7, %v633_v8  ;;  %v4853_v7 = vld [vmem:[#allocation8 + $0x28] ss:$16 sps:$4 sm:$0xff]  }
  0xa1   :  { %1454 = vmatpush1.bf16.msra.mxu0 %v4733_v12  ;;  %1497 = vmatpush1.bf16.msra.mxu1 %v4736_v13  ;;  %v635_v12 = vrot.slane %v4141_v9, %v5612_v10  ;;  %v642_v13 = vrot.slane %v628_v11, %v5612_v10  ;;  %v4861_v9 = vld [vmem:[#allocation8 + $0xc] ss:$16 sps:$4 sm:$0xff]  }
  0xa2   :  { %1455 = vmatprep.subr.bf16.mxu0 %v4741_v14  ;;  %1498 = vmatprep.subr.bf16.mxu1 %v4744_v15  ;;  %v4864_v11 = vld [vmem:[#allocation8 + $0x20c] ss:$16 sps:$4 sm:$0xff]  }
  0xa3   :  { %v643_v14 = vcombine.high %v635_v12, %v635_v12  ;;  %v644_v15 = vcombine.high %v642_v13, %v642_v13 }
  0xa5   :  { %1456 = vmatpush1.bf16.msra.mxu0 %v4739_v16  ;;  %1499 = vmatpush1.bf16.msra.mxu1 %v4742_v17 }
  0xa6   :  { %1457 = vmatprep.subr.bf16.mxu0 %v4747_v18  ;;  %1500 = vmatprep.subr.bf16.mxu1 %v4750_v19  ;;  %v646_v18 = vpack.i.b16 %v635_v12, %v635_v12  ;;  %v5616_v19 = vsub.s32 0, %v633_v8  ;;  %v4856_v8 = vld [vmem:[#allocation8 + $0x228] ss:$16 sps:$4 sm:$0xff]  }
  0xa7   :  { %v4859_v12 = vld [vmem:[#allocation8 + $0x8] ss:$16 sps:$4 sm:$0xff]  }
  0xa9   :  { %1458 = vmatpush1.bf16.msra.mxu0 %v4745_v20  ;;  %1501 = vmatpush1.bf16.msra.mxu1 %v4748_v21  ;;  %v660_v20 = vpack.i.b16 %v643_v14, %v643_v14  ;;  %v653_v21 = vpack.i.b16 %v642_v13, %v642_v13  ;;  %v4862_v13 = vld [vmem:[#allocation8 + $0x208] ss:$16 sps:$4 sm:$0xff]   ;;  %v4867_v14 = vld [vmem:[#allocation8 + $0x1ec] ss:$16 sps:$4 sm:$0xff]  }
  0xaa   :  { %1459 = vmatprep.subr.bf16.mxu0 %v4753_v22  ;;  %1502 = vmatprep.subr.bf16.mxu1 %v4756_v23  ;;  %v667_v22 = vpack.i.b16 %v644_v15, %v644_v15  ;;  %v4870_v15 = vld [vmem:[#allocation8 + $0x3ec] ss:$16 sps:$4 sm:$0xff]  }
  0xad   :  { %1460 = vmatpush1.bf16.msra.mxu0 %v4751_v24  ;;  %1503 = vmatpush1.bf16.msra.mxu1 %v4754_v25 }
  0xae   :  { %1461 = vmatprep.subr.bf16.mxu0 %v4759_v26  ;;  %1504 = vmatprep.subr.bf16.mxu1 %v4762_v27  ;;  %v651_v26 = vrot.slane %v646_v18, %v5616_v19  ;;  %v4873_v18 = vld [vmem:[#allocation8 + $0x1cc] ss:$16 sps:$4 sm:$0xff]  }
  0xb1   :  { %1462 = vmatpush1.bf16.msra.mxu0 %v4757_v28  ;;  %1505 = vmatpush1.bf16.msra.mxu1 %v4760_v29  ;;  %v665_v28 = vrot.slane %v660_v20, %v5616_v19  ;;  %v4876_v20 = vld [vmem:[#allocation8 + $0x3cc] ss:$16 sps:$4 sm:$0xff]  }
  0xb2   :  { %1463 = vmatprep.subr.bf16.mxu0 %v4765_v30  ;;  %1506 = vmatprep.subr.bf16.mxu1 %v4768_v31  ;;  %v658_v31 = vrot.slane %v653_v21, %v5616_v19  ;;  %v4871_v21 = vld [vmem:[#allocation8 + $0x1c8] ss:$16 sps:$4 sm:$0xff]  }
  0xb5   :  { %1464 = vmatpush1.bf16.msra.mxu0 %v4763_v32  ;;  %1507 = vmatpush1.bf16.msra.mxu1 %v4766_v33  ;;  %v672_v32 = vrot.slane %v667_v22, %v5616_v19  ;;  %v4874_v22 = vld [vmem:[#allocation8 + $0x3c8] ss:$16 sps:$4 sm:$0xff]  }
  0xb6   :  { %1465 = vmatprep.subr.bf16.mxu0 %v4771_v34  ;;  %1508 = vmatprep.subr.bf16.mxu1 %v4774_v35 }
  0xb9   :  { %1466 = vmatpush2.bf16.msra.mxu0 %v4769_v36  ;;  %1509 = vmatpush2.bf16.msra.mxu1 %v4772_v37 }
  0xba   :  { %1467 = vmatprep.subr.bf16.mxu0 %v4777_v38  ;;  %1510 = vmatprep.subr.bf16.mxu1 %v4780_v39 }
  0xbd   :  { %1468 = vmatpush2.bf16.msra.mxu0 %v4775_v40  ;;  %1511 = vmatpush2.bf16.msra.mxu1 %v4778_v41  ;;  %v5513_v41 = vmov 0  }
  0xbe   :  { %1469 = vmatprep.subr.bf16.mxu0 %v4783_v42  ;;  %1512 = vmatprep.subr.bf16.mxu1 %v4786_v43 }
  0xc1   :  { %1470 = vmatpush2.bf16.msra.mxu0 %v4781_v44  ;;  %1513 = vmatpush2.bf16.msra.mxu1 %v4784_v45  ;;  %v4817_v44 = vld [vmem:[#allocation8 + $0xe8] ss:$16 sps:$4 sm:$0xff]  }
  0xc2   :  { %1471 = vmatprep.subr.bf16.mxu0 %v4789_v46  ;;  %1514 = vmatprep.subr.bf16.mxu1 %v4792_v47  ;;  %v4820_v45 = vld [vmem:[#allocation8 + $0x2e8] ss:$16 sps:$4 sm:$0xff]  }
  0xc5   :  { %1472 = vmatpush2.bf16.msra.mxu0 %v4787_v48  ;;  %1515 = vmatpush2.bf16.msra.mxu1 %v4790_v49  ;;  %v4825_v48 = vld [vmem:[#allocation8 + $0xcc] ss:$16 sps:$4 sm:$0xff]  }
  0xc6   :  { %1473 = vmatprep.subr.bf16.mxu0 %v4795_v50  ;;  %1516 = vmatprep.subr.bf16.mxu1 %v4798_v51  ;;  %v4828_v49 = vld [vmem:[#allocation8 + $0x2cc] ss:$16 sps:$4 sm:$0xff]   ;;  %v4823_v50 = vld [vmem:[#allocation8 + $0xc8] ss:$16 sps:$4 sm:$0xff]  }
  0xc7   :  { %v4826_v51 = vld [vmem:[#allocation8 + $0x2c8] ss:$16 sps:$4 sm:$0xff]  }
  0xc9   :  { %1474 = vmatpush2.bf16.msra.mxu0 %v4793_v52  ;;  %1517 = vmatpush2.bf16.msra.mxu1 %v4796_v53  ;;  %v4831_v52 = vld [vmem:[#allocation8 + $0xac] ss:$16 sps:$4 sm:$0xff]  }
  0xca   :  { %1475 = vmatprep.subr.bf16.mxu0 %v4801_v54  ;;  %1518 = vmatprep.subr.bf16.mxu1 %v4804_v55  ;;  %v4834_v53 = vld [vmem:[#allocation8 + $0x2ac] ss:$16 sps:$4 sm:$0xff]   ;;  %v4829_v54 = vld [vmem:[#allocation8 + $0xa8] ss:$16 sps:$4 sm:$0xff]  }
  0xcb   :  { %v4832_v55 = vld [vmem:[#allocation8 + $0x2a8] ss:$16 sps:$4 sm:$0xff]  }
  0xcd   :  { %1476 = vmatpush2.bf16.msra.mxu0 %v4799_v56  ;;  %1519 = vmatpush2.bf16.msra.mxu1 %v4802_v57  ;;  %v4837_v56 = vld [vmem:[#allocation8 + $0x8c] ss:$16 sps:$4 sm:$0xff]  }
  0xce   :  { %1477 = vmatprep.subr.bf16.mxu0 %v4807_v58  ;;  %1520 = vmatprep.subr.bf16.mxu1 %v4810_v59  ;;  %v4840_v57 = vld [vmem:[#allocation8 + $0x28c] ss:$16 sps:$4 sm:$0xff]   ;;  %v4835_v58 = vld [vmem:[#allocation8 + $0x88] ss:$16 sps:$4 sm:$0xff]  }
  0xcf   :  { %v4838_v59 = vld [vmem:[#allocation8 + $0x288] ss:$16 sps:$4 sm:$0xff]  }
  0xd1   :  { %1478 = vmatpush2.bf16.msra.mxu0 %v4805_v60  ;;  %1521 = vmatpush2.bf16.msra.mxu1 %v4808_v61  ;;  %v4843_v60 = vld [vmem:[#allocation8 + $0x6c] ss:$16 sps:$4 sm:$0xff]  }
  0xd2   :  { %1479 = vmatprep.subr.bf16.mxu0 %v4813_v62  ;;  %1522 = vmatprep.subr.bf16.mxu1 %v4816_v63  ;;  %v4846_v61 = vld [vmem:[#allocation8 + $0x26c] ss:$16 sps:$4 sm:$0xff]   ;;  %v4841_v62 = vld [vmem:[#allocation8 + $0x68] ss:$16 sps:$4 sm:$0xff]  }
  0xd3   :  { %v4844_v63 = vld [vmem:[#allocation8 + $0x268] ss:$16 sps:$4 sm:$0xff]  }
  0xd5   :  { %1480 = vmatpush2.bf16.msra.mxu0 %v4811_v0  ;;  %1523 = vmatpush2.bf16.msra.mxu1 %v4814_v1  ;;  %v4849_v0 = vld [vmem:[#allocation8 + $0x4c] ss:$16 sps:$4 sm:$0xff]  }
  0xd6   :  { %1535 = vmatprep.subr.bf16.mxu0 %v4819_v2  ;;  %1578 = vmatprep.subr.bf16.mxu1 %v4822_v3  ;;  %v4852_v1 = vld [vmem:[#allocation8 + $0x24c] ss:$16 sps:$4 sm:$0xff]   ;;  %v4847_v2 = vld [vmem:[#allocation8 + $0x48] ss:$16 sps:$4 sm:$0xff]  }
  0xd7   :  { %v4850_v3 = vld [vmem:[#allocation8 + $0x248] ss:$16 sps:$4 sm:$0xff]  }
 0x158   :  { %v563_v16 = vpop.f32.mrf.mxu0  ;;  %v606_v17 = vpop.f32.mrf.mxu1 }
 0x15a   :  { %v565_v23 = vpop.f32.mrf.mxu0  ;;  %v608_v24 = vpop.f32.mrf.mxu1 }
 0x15c   :  { %v567_v25 = vpop.f32.mrf.mxu0  ;;  %v610_v27 = vpop.f32.mrf.mxu1 }
 0x15d   :  { %v615_v29 = vpack.c.bf16 %v567_v25, %v563_v16  ;;  %v617_v30 = vpack.c.bf16 %v610_v27, %v606_v17  ;;  %v4865_v16 = vld [vmem:[#allocation8 + $0x1e8] ss:$16 sps:$4 sm:$0xff]   ;;  %v4885_v27 = vld [vmem:[#allocation8 + $0x18c] ss:$16 sps:$4 sm:$0xff]  }
 0x15e   :  { %v569_v33 = vpop.f32.mrf.mxu0  ;;  %v612_v34 = vpop.f32.mrf.mxu1  ;;  %v4868_v17 = vld [vmem:[#allocation8 + $0x3e8] ss:$16 sps:$4 sm:$0xff]  }
 0x15f   :  { %v616_v35 = vpack.c.bf16 %v569_v33, %v565_v23  ;;  %v618_v36 = vpack.c.bf16 %v612_v34, %v608_v24  ;;  %v673_v37 = vadd.bf16 %v651_v26, %v615_v29  ;;  %v675_v38 = vadd.bf16 %v665_v28, %v617_v30  ;;  %v4879_v23 = vld [vmem:[#allocation8 + $0x1ac] ss:$16 sps:$4 sm:$0xff]   ;;  %v4877_v25 = vld [vmem:[#allocation8 + $0x1a8] ss:$16 sps:$4 sm:$0xff]  }
 0x160   :  { %v4882_v24 = vld [vmem:[#allocation8 + $0x3ac] ss:$16 sps:$4 sm:$0xff]   ;;  %v4880_v26 = vld [vmem:[#allocation8 + $0x3a8] ss:$16 sps:$4 sm:$0xff]  }
 0x161   :  { %v674_v39 = vadd.bf16 %v658_v31, %v616_v35  ;;  %v676_v40 = vadd.bf16 %v672_v32, %v618_v36  ;;  %v5625_v46 = vmax.bf16 %v5513_v41, %v673_v37  ;;  %v5628_v47 = vmax.bf16 %v5513_v41, %v675_v38  ;;  %v4888_v28 = vld [vmem:[#allocation8 + $0x38c] ss:$16 sps:$4 sm:$0xff]   ;;  %v4883_v29 = vld [vmem:[#allocation8 + $0x188] ss:$16 sps:$4 sm:$0xff]  }
 0x162   :  { %v4886_v30 = vld [vmem:[#allocation8 + $0x388] ss:$16 sps:$4 sm:$0xff]   ;;  %v4891_v31 = vld [vmem:[#allocation8 + $0x16c] ss:$16 sps:$4 sm:$0xff]  }
 0x163   :  { %v678_v42 = vmax.bf16 %v5513_v41, %v674_v39  ;;  %v680_v43 = vmax.bf16 %v5513_v41, %v676_v40  ;;  %v4894_v32 = vld [vmem:[#allocation8 + $0x36c] ss:$16 sps:$4 sm:$0xff]   ;;  %v4889_v33 = vld [vmem:[#allocation8 + $0x168] ss:$16 sps:$4 sm:$0xff]  }
 0x164   :  { %v4892_v34 = vld [vmem:[#allocation8 + $0x368] ss:$16 sps:$4 sm:$0xff]   ;;  %v4897_v35 = vld [vmem:[#allocation8 + $0x14c] ss:$16 sps:$4 sm:$0xff]  }
 0x165   :  { %1481 = vmatprep.mubr.bf16.mxu0 %v678_v42  ;;  %1524 = vmatprep.mubr.bf16.mxu1 %v680_v43  ;;  %v4900_v36 = vld [vmem:[#allocation8 + $0x34c] ss:$16 sps:$4 sm:$0xff]   ;;  %v4895_v37 = vld [vmem:[#allocation8 + $0x148] ss:$16 sps:$4 sm:$0xff]  }
 0x166   :  { %1482 = vmatmul.mubr.bf16.vlgmr.msra.gmra.mxu0 %v5625_v46  ;;  %1525 = vmatmul.mubr.bf16.vlgmr.msra.gmra.mxu1 %v5628_v47  ;;  %v4898_v38 = vld [vmem:[#allocation8 + $0x348] ss:$16 sps:$4 sm:$0xff]   ;;  %v4903_v39 = vld [vmem:[#allocation8 + $0x12c] ss:$16 sps:$4 sm:$0xff]  }
 0x167   :  { %1536 = vmatpush1.bf16.msra.mxu0 %v4817_v44  ;;  %1579 = vmatpush1.bf16.msra.mxu1 %v4820_v45  ;;  %v4906_v40 = vld [vmem:[#allocation8 + $0x32c] ss:$16 sps:$4 sm:$0xff]  }
 0x168   :  { %1567 = vmatprep.mubr.bf16.mxu0 %v678_v42  ;;  %1610 = vmatprep.mubr.bf16.mxu1 %v680_v43  ;;  %v4901_v42 = vld [vmem:[#allocation8 + $0x128] ss:$16 sps:$4 sm:$0xff]   ;;  %v4909_v44 = vld [vmem:[#allocation8 + $0x10c] ss:$16 sps:$4 sm:$0xff]  }
 0x169   :  { %1537 = vmatprep.subr.bf16.mxu0 %v4825_v48  ;;  %1580 = vmatprep.subr.bf16.mxu1 %v4828_v49  ;;  %v4904_v43 = vld [vmem:[#allocation8 + $0x328] ss:$16 sps:$4 sm:$0xff]   ;;  %v4912_v45 = vld [vmem:[#allocation8 + $0x30c] ss:$16 sps:$4 sm:$0xff]  }
 0x16a   :  { %v4907_v48 = vld [vmem:[#allocation8 + $0x108] ss:$16 sps:$4 sm:$0xff]  }
 0x16b   :  { %1538 = vmatpush1.bf16.msra.mxu0 %v4823_v50  ;;  %1581 = vmatpush1.bf16.msra.mxu1 %v4826_v51  ;;  %v4910_v49 = vld [vmem:[#allocation8 + $0x308] ss:$16 sps:$4 sm:$0xff]   ;;  %v4915_v50 = vld [vmem:[#allocation10 + $0xe4] ss:$16 sps:$4 sm:$0xff]   ;;  %v4913_v51 = vld [vmem:[#allocation10 + $0xe0] ss:$16 sps:$4 sm:$0xff]  }
 0x16c   :  { %1539 = vmatprep.subr.bf16.mxu0 %v4831_v52  ;;  %1582 = vmatprep.subr.bf16.mxu1 %v4834_v53  ;;  %v4918_v52 = vld [vmem:[#allocation10 + $0xc4] ss:$16 sps:$4 sm:$0xff]   ;;  %v4916_v53 = vld [vmem:[#allocation10 + $0xc0] ss:$16 sps:$4 sm:$0xff]  }
 0x16f   :  { %1540 = vmatpush1.bf16.msra.mxu0 %v4829_v54  ;;  %1583 = vmatpush1.bf16.msra.mxu1 %v4832_v55  ;;  %v4921_v54 = vld [vmem:[#allocation10 + $0xa4] ss:$16 sps:$4 sm:$0xff]   ;;  %v4919_v55 = vld [vmem:[#allocation10 + $0xa0] ss:$16 sps:$4 sm:$0xff]  }
 0x170   :  { %1541 = vmatprep.subr.bf16.mxu0 %v4837_v56  ;;  %1584 = vmatprep.subr.bf16.mxu1 %v4840_v57  ;;  %v4924_v56 = vld [vmem:[#allocation10 + $0x84] ss:$16 sps:$4 sm:$0xff]   ;;  %v4922_v57 = vld [vmem:[#allocation10 + $0x80] ss:$16 sps:$4 sm:$0xff]  }
 0x173   :  { %1542 = vmatpush1.bf16.msra.mxu0 %v4835_v58  ;;  %1585 = vmatpush1.bf16.msra.mxu1 %v4838_v59  ;;  %v4927_v58 = vld [vmem:[#allocation10 + $0x64] ss:$16 sps:$4 sm:$0xff]   ;;  %v4961_v59 = vld [vmem:[#allocation10 + $0x2e0] ss:$16 sps:$4 sm:$0xff]  }
 0x174   :  { %1543 = vmatprep.subr.bf16.mxu0 %v4843_v60  ;;  %1586 = vmatprep.subr.bf16.mxu1 %v4846_v61  ;;  %v4963_v60 = vld [vmem:[#allocation10 + $0x2e4] ss:$16 sps:$4 sm:$0xff]   ;;  %v4925_v61 = vld [vmem:[#allocation10 + $0x60] ss:$16 sps:$4 sm:$0xff]  }
 0x177   :  { %1544 = vmatpush1.bf16.msra.mxu0 %v4841_v62  ;;  %1587 = vmatpush1.bf16.msra.mxu1 %v4844_v63  ;;  %v4967_v62 = vld [vmem:[#allocation10 + $0x2c0] ss:$16 sps:$4 sm:$0xff]   ;;  %v4969_v63 = vld [vmem:[#allocation10 + $0x2c4] ss:$16 sps:$4 sm:$0xff]  }
 0x178   :  { %1545 = vmatprep.subr.bf16.mxu0 %v4849_v0  ;;  %1588 = vmatprep.subr.bf16.mxu1 %v4852_v1  ;;  %v4933_v0 = vld [vmem:[#allocation10 + $0x24] ss:$16 sps:$4 sm:$0xff]   ;;  %v4931_v1 = vld [vmem:[#allocation10 + $0x20] ss:$16 sps:$4 sm:$0xff]  }
 0x17b   :  { %1546 = vmatpush1.bf16.msra.mxu0 %v4847_v2  ;;  %1589 = vmatpush1.bf16.msra.mxu1 %v4850_v3  ;;  %v4973_v2 = vld [vmem:[#allocation10 + $0x2a0] ss:$16 sps:$4 sm:$0xff]   ;;  %v4975_v3 = vld [vmem:[#allocation10 + $0x2a4] ss:$16 sps:$4 sm:$0xff]  }
 0x17c   :  { %1547 = vmatprep.subr.bf16.mxu0 %v4855_v4  ;;  %1590 = vmatprep.subr.bf16.mxu1 %v4858_v5  ;;  %v4936_v4 = vld [vmem:[#allocation10 + $0x4] ss:$16 sps:$4 sm:$0xff]   ;;  %v4934_v5 = vld [vmem:[#allocation10] ss:$16 sps:$4 sm:$0xff]  }
 0x17f   :  { %1548 = vmatpush1.bf16.msra.mxu0 %v4853_v7  ;;  %1591 = vmatpush1.bf16.msra.mxu1 %v4856_v8  ;;  %v4979_v7 = vld [vmem:[#allocation10 + $0x280] ss:$16 sps:$4 sm:$0xff]   ;;  %v4981_v8 = vld [vmem:[#allocation10 + $0x284] ss:$16 sps:$4 sm:$0xff]  }
 0x180   :  { %1549 = vmatprep.subr.bf16.mxu0 %v4861_v9  ;;  %1592 = vmatprep.subr.bf16.mxu1 %v4864_v11  ;;  %v4939_v9 = vld [vmem:[#allocation10 + $0x1e4] ss:$16 sps:$4 sm:$0xff]   ;;  %v4937_v11 = vld [vmem:[#allocation10 + $0x1e0] ss:$16 sps:$4 sm:$0xff]  }
 0x183   :  { %1550 = vmatpush1.bf16.msra.mxu0 %v4859_v12  ;;  %1593 = vmatpush1.bf16.msra.mxu1 %v4862_v13  ;;  %v4985_v12 = vld [vmem:[#allocation10 + $0x260] ss:$16 sps:$4 sm:$0xff]   ;;  %v4987_v13 = vld [vmem:[#allocation10 + $0x264] ss:$16 sps:$4 sm:$0xff]  }
 0x184   :  { %1551 = vmatprep.subr.bf16.mxu0 %v4867_v14  ;;  %1594 = vmatprep.subr.bf16.mxu1 %v4870_v15  ;;  %v4942_v14 = vld [vmem:[#allocation10 + $0x1c4] ss:$16 sps:$4 sm:$0xff]   ;;  %v4940_v15 = vld [vmem:[#allocation10 + $0x1c0] ss:$16 sps:$4 sm:$0xff]  }
 0x187   :  { %1552 = vmatpush2.bf16.msra.mxu0 %v4865_v16  ;;  %1595 = vmatpush2.bf16.msra.mxu1 %v4868_v17  ;;  %v4991_v16 = vld [vmem:[#allocation10 + $0x240] ss:$16 sps:$4 sm:$0xff]   ;;  %v4993_v17 = vld [vmem:[#allocation10 + $0x244] ss:$16 sps:$4 sm:$0xff]  }
 0x188   :  { %1553 = vmatprep.subr.bf16.mxu0 %v4873_v18  ;;  %1596 = vmatprep.subr.bf16.mxu1 %v4876_v20  ;;  %v4945_v18 = vld [vmem:[#allocation10 + $0x1a4] ss:$16 sps:$4 sm:$0xff]   ;;  %v4943_v20 = vld [vmem:[#allocation10 + $0x1a0] ss:$16 sps:$4 sm:$0xff]  }
 0x18b   :  { %1554 = vmatpush2.bf16.msra.mxu0 %v4871_v21  ;;  %1597 = vmatpush2.bf16.msra.mxu1 %v4874_v22  ;;  %v4997_v21 = vld [vmem:[#allocation10 + $0x220] ss:$16 sps:$4 sm:$0xff]   ;;  %v4999_v22 = vld [vmem:[#allocation10 + $0x224] ss:$16 sps:$4 sm:$0xff]  }
 0x18c   :  { %1555 = vmatprep.subr.bf16.mxu0 %v4879_v23  ;;  %1598 = vmatprep.subr.bf16.mxu1 %v4882_v24  ;;  %v4948_v23 = vld [vmem:[#allocation10 + $0x184] ss:$16 sps:$4 sm:$0xff]   ;;  %v4946_v24 = vld [vmem:[#allocation10 + $0x180] ss:$16 sps:$4 sm:$0xff]  }
 0x18f   :  { %1556 = vmatpush2.bf16.msra.mxu0 %v4877_v25  ;;  %1599 = vmatpush2.bf16.msra.mxu1 %v4880_v26  ;;  %v5003_v25 = vld [vmem:[#allocation10 + $0x200] ss:$16 sps:$4 sm:$0xff]   ;;  %v5005_v26 = vld [vmem:[#allocation10 + $0x204] ss:$16 sps:$4 sm:$0xff]  }
 0x190   :  { %1557 = vmatprep.subr.bf16.mxu0 %v4885_v27  ;;  %1600 = vmatprep.subr.bf16.mxu1 %v4888_v28  ;;  %v4951_v27 = vld [vmem:[#allocation10 + $0x164] ss:$16 sps:$4 sm:$0xff]   ;;  %v4949_v28 = vld [vmem:[#allocation10 + $0x160] ss:$16 sps:$4 sm:$0xff]  }
 0x193   :  { %1558 = vmatpush2.bf16.msra.mxu0 %v4883_v29  ;;  %1601 = vmatpush2.bf16.msra.mxu1 %v4886_v30  ;;  %v5009_v29 = vld [vmem:[#allocation10 + $0x3e0] ss:$16 sps:$4 sm:$0xff]   ;;  %v5011_v30 = vld [vmem:[#allocation10 + $0x3e4] ss:$16 sps:$4 sm:$0xff]  }
 0x194   :  { %1559 = vmatprep.subr.bf16.mxu0 %v4891_v31  ;;  %1602 = vmatprep.subr.bf16.mxu1 %v4894_v32  ;;  %v4954_v31 = vld [vmem:[#allocation10 + $0x144] ss:$16 sps:$4 sm:$0xff]   ;;  %v4952_v32 = vld [vmem:[#allocation10 + $0x140] ss:$16 sps:$4 sm:$0xff]  }
 0x197   :  { %1560 = vmatpush2.bf16.msra.mxu0 %v4889_v33  ;;  %1603 = vmatpush2.bf16.msra.mxu1 %v4892_v34  ;;  %v5015_v33 = vld [vmem:[#allocation10 + $0x3c0] ss:$16 sps:$4 sm:$0xff]   ;;  %v5017_v34 = vld [vmem:[#allocation10 + $0x3c4] ss:$16 sps:$4 sm:$0xff]  }
 0x198   :  { %1561 = vmatprep.subr.bf16.mxu0 %v4897_v35  ;;  %1604 = vmatprep.subr.bf16.mxu1 %v4900_v36  ;;  %v4957_v35 = vld [vmem:[#allocation10 + $0x124] ss:$16 sps:$4 sm:$0xff]   ;;  %v4955_v36 = vld [vmem:[#allocation10 + $0x120] ss:$16 sps:$4 sm:$0xff]  }
 0x19b   :  { %1562 = vmatpush2.bf16.msra.mxu0 %v4895_v37  ;;  %1605 = vmatpush2.bf16.msra.mxu1 %v4898_v38  ;;  %v5021_v37 = vld [vmem:[#allocation10 + $0x3a0] ss:$16 sps:$4 sm:$0xff]   ;;  %v5023_v38 = vld [vmem:[#allocation10 + $0x3a4] ss:$16 sps:$4 sm:$0xff]  }
 0x19c   :  { %1563 = vmatprep.subr.bf16.mxu0 %v4903_v39  ;;  %1606 = vmatprep.subr.bf16.mxu1 %v4906_v40  ;;  %v4960_v39 = vld [vmem:[#allocation10 + $0x104] ss:$16 sps:$4 sm:$0xff]   ;;  %v4958_v40 = vld [vmem:[#allocation10 + $0x100] ss:$16 sps:$4 sm:$0xff]  }
 0x19f   :  { %1564 = vmatpush2.bf16.msra.mxu0 %v4901_v42  ;;  %1607 = vmatpush2.bf16.msra.mxu1 %v4904_v43  ;;  %v5027_v42 = vld [vmem:[#allocation10 + $0x380] ss:$16 sps:$4 sm:$0xff]   ;;  %v5029_v43 = vld [vmem:[#allocation10 + $0x384] ss:$16 sps:$4 sm:$0xff]  }
 0x1a0   :  { %1565 = vmatprep.subr.bf16.mxu0 %v4909_v44  ;;  %1608 = vmatprep.subr.bf16.mxu1 %v4912_v45  ;;  %v4966_v44 = vld [vmem:[#allocation10 + $0xec] ss:$16 sps:$4 sm:$0xff]   ;;  %v5033_v45 = vld [vmem:[#allocation10 + $0x360] ss:$16 sps:$4 sm:$0xff]  }
 0x1a3   :  { %1566 = vmatpush2.bf16.msra.mxu0 %v4907_v48  ;;  %1609 = vmatpush2.bf16.msra.mxu1 %v4910_v49  ;;  %v5035_v48 = vld [vmem:[#allocation10 + $0x364] ss:$16 sps:$4 sm:$0xff]  }
 0x1a4   :  { %2455 = vmatprep.subr.bf16.mxu0 %v4915_v50  ;;  %2498 = vmatprep.subr.bf16.mxu1 %v4963_v60  ;;  %v5041_v49 = vld [vmem:[#allocation10 + $0x344] ss:$16 sps:$4 sm:$0xff]   ;;  %v5039_v50 = vld [vmem:[#allocation10 + $0x340] ss:$16 sps:$4 sm:$0xff]  }
 0x1a6   :  { %1568 = vmatmul.mubr.bf16.vlgmr.msra.gmra.mxu0 %v5625_v46  ;;  %1611 = vmatmul.mubr.bf16.vlgmr.msra.gmra.mxu1 %v5628_v47  ;;  %v4930_v46 = vld [vmem:[#allocation10 + $0x44] ss:$16 sps:$4 sm:$0xff]   ;;  %v4928_v47 = vld [vmem:[#allocation10 + $0x40] ss:$16 sps:$4 sm:$0xff]  }
 0x1a7   :  { %2456 = vmatpush1.bf16.msra.mxu0 %v4913_v51  ;;  %2499 = vmatpush1.bf16.msra.mxu1 %v4961_v59  ;;  %v5047_v51 = vld [vmem:[#allocation10 + $0x324] ss:$16 sps:$4 sm:$0xff]  }
 0x1a8   :  { %2457 = vmatprep.subr.bf16.mxu0 %v4918_v52  ;;  %2500 = vmatprep.subr.bf16.mxu1 %v4969_v63  ;;  %v5045_v52 = vld [vmem:[#allocation10 + $0x320] ss:$16 sps:$4 sm:$0xff]  }
 0x1ab   :  { %2458 = vmatpush1.bf16.msra.mxu0 %v4916_v53  ;;  %2501 = vmatpush1.bf16.msra.mxu1 %v4967_v62  ;;  %v5053_v53 = vld [vmem:[#allocation10 + $0x304] ss:$16 sps:$4 sm:$0xff]  }
 0x1ac   :  { %2459 = vmatprep.subr.bf16.mxu0 %v4921_v54  ;;  %2502 = vmatprep.subr.bf16.mxu1 %v4975_v3  ;;  %v5051_v54 = vld [vmem:[#allocation10 + $0x300] ss:$16 sps:$4 sm:$0xff]  }
 0x1af   :  { %2460 = vmatpush1.bf16.msra.mxu0 %v4919_v55  ;;  %2503 = vmatpush1.bf16.msra.mxu1 %v4973_v2  ;;  %v5059_v55 = vld [vmem:[#allocation10 + $0x2ec] ss:$16 sps:$4 sm:$0xff]  }
 0x1b0   :  { %2461 = vmatprep.subr.bf16.mxu0 %v4924_v56  ;;  %2504 = vmatprep.subr.bf16.mxu1 %v4981_v8  ;;  %v4270_v56 = vld.sshfl [vmem:[%s5727_s4] sm:$0x33 pattern:$0x75316420] }
 0x1b3   :  { %2462 = vmatpush1.bf16.msra.mxu0 %v4922_v57  ;;  %2505 = vmatpush1.bf16.msra.mxu1 %v4979_v7  ;;  %v1634_v57 = vcombine.high %v4270_v56, %v4270_v56 }
 0x1b4   :  { %2463 = vmatprep.subr.bf16.mxu0 %v4927_v58  ;;  %2506 = vmatprep.subr.bf16.mxu1 %v4987_v13  ;;  %v5638_v58 = vrot.slane %v4270_v56, %v5612_v10  ;;  %v5050_v56 = vld [vmem:[#allocation10 + $0x12c] ss:$16 sps:$4 sm:$0xff]  }
 0x1b5   :  { %v5641_v59 = vrot.slane %v1634_v57, %v5612_v10 }
 0x1b6   :  { %v1652_v62 = vpack.i.b16 %v5638_v58, %v5638_v58 }
 0x1b7   :  { %2464 = vmatpush1.bf16.msra.mxu0 %v4925_v61  ;;  %2507 = vmatpush1.bf16.msra.mxu1 %v4985_v12  ;;  %v1659_v63 = vpack.i.b16 %v5641_v59, %v5641_v59 }
 0x1b8   :  { %2465 = vmatprep.subr.bf16.mxu0 %v4930_v46  ;;  %2508 = vmatprep.subr.bf16.mxu1 %v4993_v17  ;;  %v4964_v17 = vld [vmem:[#allocation10 + $0xe8] ss:$16 sps:$4 sm:$0xff]  }
 0x1b9   :  { %v1664_v12 = vrot.slane %v1659_v63, %v5616_v19 }
 0x1bb   :  { %2466 = vmatpush1.bf16.msra.mxu0 %v4928_v47  ;;  %2509 = vmatpush1.bf16.msra.mxu1 %v4991_v16 }
 0x1bc   :  { %2467 = vmatprep.subr.bf16.mxu0 %v4933_v0  ;;  %2510 = vmatprep.subr.bf16.mxu1 %v4999_v22  ;;  %v4978_v22 = vld [vmem:[#allocation10 + $0xac] ss:$16 sps:$4 sm:$0xff]  }
 0x1bf   :  { %2468 = vmatpush1.bf16.msra.mxu0 %v4931_v1  ;;  %2511 = vmatpush1.bf16.msra.mxu1 %v4997_v21  ;;  %v4970_v21 = vld [vmem:[#allocation10 + $0xc8] ss:$16 sps:$4 sm:$0xff]  }
 0x1c0   :  { %2469 = vmatprep.subr.bf16.mxu0 %v4936_v4  ;;  %2512 = vmatprep.subr.bf16.mxu1 %v5005_v26  ;;  %v1657_v4 = vrot.slane %v1652_v62, %v5616_v19  ;;  %v4990_v26 = vld [vmem:[#allocation10 + $0x6c] ss:$16 sps:$4 sm:$0xff]  }
 0x1c3   :  { %2470 = vmatpush1.bf16.msra.mxu0 %v4934_v5  ;;  %2513 = vmatpush1.bf16.msra.mxu1 %v5003_v25  ;;  %v4982_v25 = vld [vmem:[#allocation10 + $0x88] ss:$16 sps:$4 sm:$0xff]  }
 0x1c4   :  { %2471 = vmatprep.subr.bf16.mxu0 %v4939_v9  ;;  %2514 = vmatprep.subr.bf16.mxu1 %v5011_v30  ;;  %v5002_v30 = vld [vmem:[#allocation10 + $0x2c] ss:$16 sps:$4 sm:$0xff]  }
 0x1c7   :  { %2472 = vmatpush2.bf16.msra.mxu0 %v4937_v11  ;;  %2515 = vmatpush2.bf16.msra.mxu1 %v5009_v29  ;;  %v4994_v29 = vld [vmem:[#allocation10 + $0x48] ss:$16 sps:$4 sm:$0xff]  }
 0x1c8   :  { %2473 = vmatprep.subr.bf16.mxu0 %v4942_v14  ;;  %2516 = vmatprep.subr.bf16.mxu1 %v5017_v34  ;;  %v5014_v34 = vld [vmem:[#allocation10 + $0x1ec] ss:$16 sps:$4 sm:$0xff]  }
 0x1cb   :  { %2474 = vmatpush2.bf16.msra.mxu0 %v4940_v15  ;;  %2517 = vmatpush2.bf16.msra.mxu1 %v5015_v33  ;;  %v5006_v33 = vld [vmem:[#allocation10 + $0x8] ss:$16 sps:$4 sm:$0xff]  }
 0x1cc   :  { %2475 = vmatprep.subr.bf16.mxu0 %v4945_v18  ;;  %2518 = vmatprep.subr.bf16.mxu1 %v5023_v38  ;;  %v5026_v38 = vld [vmem:[#allocation10 + $0x1ac] ss:$16 sps:$4 sm:$0xff]  }
 0x1cf   :  { %2476 = vmatpush2.bf16.msra.mxu0 %v4943_v20  ;;  %2519 = vmatpush2.bf16.msra.mxu1 %v5021_v37  ;;  %v4972_v20 = vld [vmem:[#allocation10 + $0xcc] ss:$16 sps:$4 sm:$0xff]   ;;  %v5018_v37 = vld [vmem:[#allocation10 + $0x1c8] ss:$16 sps:$4 sm:$0xff]  }
 0x1d0   :  { %2477 = vmatprep.subr.bf16.mxu0 %v4948_v23  ;;  %2520 = vmatprep.subr.bf16.mxu1 %v5029_v43  ;;  %v4976_v23 = vld [vmem:[#allocation10 + $0xa8] ss:$16 sps:$4 sm:$0xff]   ;;  %v5038_v43 = vld [vmem:[#allocation10 + $0x16c] ss:$16 sps:$4 sm:$0xff]  }
 0x1d3   :  { %2478 = vmatpush2.bf16.msra.mxu0 %v4946_v24  ;;  %2521 = vmatpush2.bf16.msra.mxu1 %v5027_v42  ;;  %v4984_v24 = vld [vmem:[#allocation10 + $0x8c] ss:$16 sps:$4 sm:$0xff]   ;;  %v5030_v42 = vld [vmem:[#allocation10 + $0x188] ss:$16 sps:$4 sm:$0xff]  }
 0x1d4   :  { %2479 = vmatprep.subr.bf16.mxu0 %v4951_v27  ;;  %2522 = vmatprep.subr.bf16.mxu1 %v5035_v48  ;;  %v4988_v27 = vld [vmem:[#allocation10 + $0x68] ss:$16 sps:$4 sm:$0xff]   ;;  %v5044_v48 = vld [vmem:[#allocation10 + $0x14c] ss:$16 sps:$4 sm:$0xff]  }
 0x1d7   :  { %2480 = vmatpush2.bf16.msra.mxu0 %v4949_v28  ;;  %2523 = vmatpush2.bf16.msra.mxu1 %v5033_v45  ;;  %v4996_v28 = vld [vmem:[#allocation10 + $0x4c] ss:$16 sps:$4 sm:$0xff]   ;;  %v1649_v45 = vcombine.high %v5638_v58, %v5638_v58  ;;  %v5048_v58 = vld [vmem:[#allocation10 + $0x128] ss:$16 sps:$4 sm:$0xff]  }
 0x1d8   :  { %2481 = vmatprep.subr.bf16.mxu0 %v4954_v31  ;;  %2524 = vmatprep.subr.bf16.mxu1 %v5041_v49  ;;  %v5000_v31 = vld [vmem:[#allocation10 + $0x28] ss:$16 sps:$4 sm:$0xff]   ;;  %v1650_v49 = vcombine.high %v5641_v59, %v5641_v59 }
 0x1da   :  { %v1673_v57 = vpack.i.b16 %v1650_v49, %v1650_v49  ;;  %v5128_v49 = vld [vmem:[#allocation11 + $0x4] ss:$16 sps:$4 sm:$0xff]  }
 0x1db   :  { %2482 = vmatpush2.bf16.msra.mxu0 %v4952_v32  ;;  %2525 = vmatpush2.bf16.msra.mxu1 %v5039_v50  ;;  %v5008_v32 = vld [vmem:[#allocation10 + $0xc] ss:$16 sps:$4 sm:$0xff]  }
 0x1dc   :  { %2483 = vmatprep.subr.bf16.mxu0 %v4957_v35  ;;  %2526 = vmatprep.subr.bf16.mxu1 %v5047_v51  ;;  %v5012_v35 = vld [vmem:[#allocation10 + $0x1e8] ss:$16 sps:$4 sm:$0xff]  }
 0x1df   :  { %2484 = vmatpush2.bf16.msra.mxu0 %v4955_v36  ;;  %2527 = vmatpush2.bf16.msra.mxu1 %v5045_v52  ;;  %v5020_v36 = vld [vmem:[#allocation10 + $0x1cc] ss:$16 sps:$4 sm:$0xff]   ;;  %v5042_v52 = vld [vmem:[#allocation10 + $0x148] ss:$16 sps:$4 sm:$0xff]  }
 0x1e0   :  { %2485 = vmatprep.subr.bf16.mxu0 %v4960_v39  ;;  %2528 = vmatprep.subr.bf16.mxu1 %v5053_v53  ;;  %v5024_v39 = vld [vmem:[#allocation10 + $0x1a8] ss:$16 sps:$4 sm:$0xff]  }
 0x1e3   :  { %2486 = vmatpush2.bf16.msra.mxu0 %v4958_v40  ;;  %2529 = vmatpush2.bf16.msra.mxu1 %v5051_v54  ;;  %v5032_v40 = vld [vmem:[#allocation10 + $0x18c] ss:$16 sps:$4 sm:$0xff]  }
 0x1e4   :  { %2541 = vmatprep.subr.bf16.mxu0 %v4966_v44  ;;  %2584 = vmatprep.subr.bf16.mxu1 %v5059_v55  ;;  %v5036_v44 = vld [vmem:[#allocation10 + $0x168] ss:$16 sps:$4 sm:$0xff]   ;;  %v1666_v55 = vpack.i.b16 %v1649_v45, %v1649_v45  ;;  %v5123_v45 = vld [vmem:[#allocation11 + $0x20] ss:$16 sps:$4 sm:$0xff]  }
 0x1e6   :  { %v1671_v62 = vrot.slane %v1666_v55, %v5616_v19  ;;  %v5129_v55 = vld [vmem:[#allocation11 + $0x1e0] ss:$16 sps:$4 sm:$0xff]  }
 0x226   :  { %v1483_v60 = vpop.f32.mrf.mxu0  ;;  %v1526_v61 = vpop.f32.mrf.mxu1 }
 0x227   :  { %v1527_v2 = vadd.f32 %v1526_v61, %v1483_v60 }
 0x228   :  { %v1485_v46 = vpop.f32.mrf.mxu0  ;;  %v1528_v47 = vpop.f32.mrf.mxu1 }
 0x229   :  { %v1529_v8 = vadd.f32 %v1528_v47, %v1485_v46 }
 0x22a   :  { %v1487_v0 = vpop.f32.mrf.mxu0  ;;  %v1530_v1 = vpop.f32.mrf.mxu1 }
 0x22b   :  { %v1531_v3 = vadd.f32 %v1530_v1, %v1487_v0  ;;  %v5056_v0 = vld [vmem:[#allocation10 + $0x10c] ss:$16 sps:$4 sm:$0xff]  }
 0x22c   :  { %v1489_v5 = vpop.f32.mrf.mxu0  ;;  %v1532_v7 = vpop.f32.mrf.mxu1 }
 0x22d   :  { %v1621_v9 = vpack.c.bf16 %v1531_v3, %v1527_v2  ;;  %v1533_v11 = vadd.f32 %v1532_v7, %v1489_v5  ;;  %v5054_v7 = vld [vmem:[#allocation10 + $0x108] ss:$16 sps:$4 sm:$0xff]  }
 0x22f   :  { %v1622_v13 = vpack.c.bf16 %v1533_v11, %v1529_v8  ;;  %v1679_v14 = vadd.bf16 %v1657_v4, %v1621_v9  ;;  %v1678_v4 = vrot.slane %v1673_v57, %v5616_v19  ;;  %v5134_v57 = vld [vmem:[#allocation11 + $0x1c4] ss:$16 sps:$4 sm:$0xff]  }
 0x231   :  { %v1680_v15 = vadd.bf16 %v1664_v12, %v1622_v13  ;;  %v5651_v18 = vmax.bf16 %v5513_v41, %v1679_v14  ;;  %v5057_v12 = vld [vmem:[#allocation10 + $0x2e8] ss:$16 sps:$4 sm:$0xff]   ;;  %v5062_v14 = vld [vmem:[#allocation10 + $0x2cc] ss:$16 sps:$4 sm:$0xff]  }
 0x233   :  { %v1684_v16 = vmax.bf16 %v5513_v41, %v1680_v15  ;;  %v5060_v15 = vld [vmem:[#allocation10 + $0x2c8] ss:$16 sps:$4 sm:$0xff]  }
 0x235   :  { %2487 = vmatprep.mubr.bf16.mxu0 %v1684_v16 }
 0x236   :  { %2488 = vmatmul.mubr.bf16.vlgmr.msra.gmra.mxu0 %v5651_v18 }
 0x237   :  { %2542 = vmatpush1.bf16.msra.mxu0 %v4964_v17  ;;  %2573 = vmatprep.mubr.bf16.mxu0 %v1684_v16  ;;  %v5065_v16 = vld [vmem:[#allocation10 + $0x2ac] ss:$16 sps:$4 sm:$0xff]   ;;  %v5063_v17 = vld [vmem:[#allocation10 + $0x2a8] ss:$16 sps:$4 sm:$0xff]  }
 0x238   :  { %2543 = vmatprep.subr.bf16.mxu0 %v4972_v20  ;;  %v5068_v20 = vld [vmem:[#allocation10 + $0x28c] ss:$16 sps:$4 sm:$0xff]  }
 0x23b   :  { %2544 = vmatpush1.bf16.msra.mxu0 %v4970_v21  ;;  %v5105_v21 = vld [vmem:[#allocation11 + $0xe0] ss:$16 sps:$4 sm:$0xff]  }
 0x23c   :  { %2545 = vmatprep.subr.bf16.mxu0 %v4978_v22  ;;  %v5107_v22 = vld [vmem:[#allocation11 + $0xe4] ss:$16 sps:$4 sm:$0xff]  }
 0x23f   :  { %2546 = vmatpush1.bf16.msra.mxu0 %v4976_v23  ;;  %v5110_v23 = vld [vmem:[#allocation11 + $0xc4] ss:$16 sps:$4 sm:$0xff]  }
 0x240   :  { %2547 = vmatprep.subr.bf16.mxu0 %v4984_v24  ;;  %v5066_v24 = vld [vmem:[#allocation10 + $0x288] ss:$16 sps:$4 sm:$0xff]  }
 0x243   :  { %2548 = vmatpush1.bf16.msra.mxu0 %v4982_v25  ;;  %v5108_v25 = vld [vmem:[#allocation11 + $0xc0] ss:$16 sps:$4 sm:$0xff]  }
 0x244   :  { %2549 = vmatprep.subr.bf16.mxu0 %v4990_v26  ;;  %v5071_v26 = vld [vmem:[#allocation10 + $0x26c] ss:$16 sps:$4 sm:$0xff]  }
 0x247   :  { %2550 = vmatpush1.bf16.msra.mxu0 %v4988_v27  ;;  %v5069_v27 = vld [vmem:[#allocation10 + $0x268] ss:$16 sps:$4 sm:$0xff]  }
 0x248   :  { %2551 = vmatprep.subr.bf16.mxu0 %v4996_v28  ;;  %v5111_v28 = vld [vmem:[#allocation11 + $0xa0] ss:$16 sps:$4 sm:$0xff]  }
 0x24b   :  { %2552 = vmatpush1.bf16.msra.mxu0 %v4994_v29  ;;  %v5074_v29 = vld [vmem:[#allocation10 + $0x24c] ss:$16 sps:$4 sm:$0xff]  }
 0x24c   :  { %2553 = vmatprep.subr.bf16.mxu0 %v5002_v30  ;;  %v5116_v30 = vld [vmem:[#allocation11 + $0x84] ss:$16 sps:$4 sm:$0xff]  }
 0x24f   :  { %2554 = vmatpush1.bf16.msra.mxu0 %v5000_v31  ;;  %v5072_v31 = vld [vmem:[#allocation10 + $0x248] ss:$16 sps:$4 sm:$0xff]  }
 0x250   :  { %2555 = vmatprep.subr.bf16.mxu0 %v5008_v32  ;;  %v5114_v32 = vld [vmem:[#allocation11 + $0x80] ss:$16 sps:$4 sm:$0xff]  }
 0x253   :  { %2556 = vmatpush1.bf16.msra.mxu0 %v5006_v33  ;;  %v5077_v33 = vld [vmem:[#allocation10 + $0x22c] ss:$16 sps:$4 sm:$0xff]  }
 0x254   :  { %2557 = vmatprep.subr.bf16.mxu0 %v5014_v34  ;;  %v5119_v34 = vld [vmem:[#allocation11 + $0x64] ss:$16 sps:$4 sm:$0xff]  }
 0x257   :  { %2558 = vmatpush2.bf16.msra.mxu0 %v5012_v35  ;;  %v5075_v35 = vld [vmem:[#allocation10 + $0x228] ss:$16 sps:$4 sm:$0xff]  }
 0x258   :  { %2559 = vmatprep.subr.bf16.mxu0 %v5020_v36  ;;  %v5117_v36 = vld [vmem:[#allocation11 + $0x60] ss:$16 sps:$4 sm:$0xff]  }
 0x25b   :  { %2560 = vmatpush2.bf16.msra.mxu0 %v5018_v37  ;;  %v5080_v37 = vld [vmem:[#allocation10 + $0x20c] ss:$16 sps:$4 sm:$0xff]  }
 0x25c   :  { %2561 = vmatprep.subr.bf16.mxu0 %v5026_v38  ;;  %v5122_v38 = vld [vmem:[#allocation11 + $0x44] ss:$16 sps:$4 sm:$0xff]  }
 0x25f   :  { %2562 = vmatpush2.bf16.msra.mxu0 %v5024_v39  ;;  %v5078_v39 = vld [vmem:[#allocation10 + $0x208] ss:$16 sps:$4 sm:$0xff]  }
 0x260   :  { %2563 = vmatprep.subr.bf16.mxu0 %v5032_v40  ;;  %v5120_v40 = vld [vmem:[#allocation11 + $0x40] ss:$16 sps:$4 sm:$0xff]  }
 0x263   :  { %2564 = vmatpush2.bf16.msra.mxu0 %v5030_v42  ;;  %v5083_v42 = vld [vmem:[#allocation10 + $0x3ec] ss:$16 sps:$4 sm:$0xff]  }
 0x264   :  { %2565 = vmatprep.subr.bf16.mxu0 %v5038_v43  ;;  %v5125_v43 = vld [vmem:[#allocation11 + $0x24] ss:$16 sps:$4 sm:$0xff]  }
 0x266   :  { %v1569_v50 = vpop.f32.mrf.mxu0  ;;  %v1612_v51 = vpop.f32.mrf.mxu1 }
 0x267   :  { %2566 = vmatpush2.bf16.msra.mxu0 %v5036_v44  ;;  %v1613_v46 = vadd.f32 %v1612_v51, %v1569_v50  ;;  %v5081_v44 = vld [vmem:[#allocation10 + $0x3e8] ss:$16 sps:$4 sm:$0xff]   ;;  %v5126_v51 = vld [vmem:[#allocation11] ss:$16 sps:$4 sm:$0xff]  }
 0x268   :  { %v1571_v53 = vpop.f32.mrf.mxu0  ;;  %v1614_v54 = vpop.f32.mrf.mxu1  ;;  %2567 = vmatprep.subr.bf16.mxu0 %v5044_v48  ;;  %v5086_v48 = vld [vmem:[#allocation10 + $0x3cc] ss:$16 sps:$4 sm:$0xff]   ;;  %v5084_v50 = vld [vmem:[#allocation10 + $0x3c8] ss:$16 sps:$4 sm:$0xff]  }
 0x269   :  { %v1615_v1 = vadd.f32 %v1614_v54, %v1571_v53  ;;  %v5131_v53 = vld [vmem:[#allocation11 + $0x1e4] ss:$16 sps:$4 sm:$0xff]   ;;  %v5087_v54 = vld [vmem:[#allocation10 + $0x3a8] ss:$16 sps:$4 sm:$0xff]  }
 0x26a   :  { %v1573_v60 = vpop.f32.mrf.mxu0  ;;  %v1616_v61 = vpop.f32.mrf.mxu1 }
 0x26b   :  { %v1617_v47 = vadd.f32 %v1616_v61, %v1573_v60  ;;  %2568 = vmatpush2.bf16.msra.mxu0 %v5042_v52  ;;  %v5089_v52 = vld [vmem:[#allocation10 + $0x3ac] ss:$16 sps:$4 sm:$0xff]   ;;  %v5090_v60 = vld [vmem:[#allocation10 + $0x388] ss:$16 sps:$4 sm:$0xff]   ;;  %v5132_v61 = vld [vmem:[#allocation11 + $0x1c0] ss:$16 sps:$4 sm:$0xff]  }
 0x26c   :  { %v1575_v63 = vpop.f32.mrf.mxu0  ;;  %v1618_v59 = vpop.f32.mrf.mxu1  ;;  %2569 = vmatprep.subr.bf16.mxu0 %v5050_v56  ;;  %v5092_v56 = vld [vmem:[#allocation10 + $0x38c] ss:$16 sps:$4 sm:$0xff]  }
 0x26d   :  { %v1623_v2 = vpack.c.bf16 %v1617_v47, %v1613_v46  ;;  %v1619_v3 = vadd.f32 %v1618_v59, %v1575_v63  ;;  %v5095_v46 = vld [vmem:[#allocation10 + $0x36c] ss:$16 sps:$4 sm:$0xff]   ;;  %v5137_v47 = vld [vmem:[#allocation11 + $0x1a4] ss:$16 sps:$4 sm:$0xff]  }
 0x26e   :  { %v5098_v63 = vld [vmem:[#allocation10 + $0x34c] ss:$16 sps:$4 sm:$0xff]   ;;  %v5140_v59 = vld [vmem:[#allocation11 + $0x184] ss:$16 sps:$4 sm:$0xff]  }
 0x26f   :  { %v1624_v5 = vpack.c.bf16 %v1619_v3, %v1615_v1  ;;  %2570 = vmatpush2.bf16.msra.mxu0 %v5048_v58  ;;  %v1681_v8 = vadd.bf16 %v1671_v62, %v1623_v2  ;;  %v5093_v58 = vld [vmem:[#allocation10 + $0x368] ss:$16 sps:$4 sm:$0xff]   ;;  %v5135_v62 = vld [vmem:[#allocation11 + $0x1a0] ss:$16 sps:$4 sm:$0xff]   ;;  %v5101_v2 = vld [vmem:[#allocation10 + $0x32c] ss:$16 sps:$4 sm:$0xff]  }
 0x270   :  { %2571 = vmatprep.subr.bf16.mxu0 %v5056_v0  ;;  %v5096_v0 = vld [vmem:[#allocation10 + $0x348] ss:$16 sps:$4 sm:$0xff]   ;;  %v5138_v1 = vld [vmem:[#allocation11 + $0x180] ss:$16 sps:$4 sm:$0xff]   ;;  %v5143_v3 = vld [vmem:[#allocation11 + $0x164] ss:$16 sps:$4 sm:$0xff]  }
 0x271   :  { %v1682_v9 = vadd.bf16 %v1678_v4, %v1624_v5  ;;  %v5662_v13 = vmax.bf16 %v5513_v41, %v1681_v8  ;;  %v5099_v4 = vld [vmem:[#allocation10 + $0x328] ss:$16 sps:$4 sm:$0xff]   ;;  %v5141_v5 = vld [vmem:[#allocation11 + $0x160] ss:$16 sps:$4 sm:$0xff]  }
 0x272   :  { %v5102_v8 = vld [vmem:[#allocation10 + $0x308] ss:$16 sps:$4 sm:$0xff]  }
 0x273   :  { %2572 = vmatpush2.bf16.msra.mxu0 %v5054_v7  ;;  %v1686_v11 = vmax.bf16 %v5513_v41, %v1682_v9  ;;  %v5104_v7 = vld [vmem:[#allocation10 + $0x30c] ss:$16 sps:$4 sm:$0xff]   ;;  %v5146_v9 = vld [vmem:[#allocation11 + $0x144] ss:$16 sps:$4 sm:$0xff]  }
 0x274   :  { %3461 = vmatprep.subr.bf16.mxu0 %v5107_v22  ;;  %v5159_v22 = vld [vmem:[#allocation11 + $0x2c0] ss:$16 sps:$4 sm:$0xff]  }
 0x275   :  { %2530 = vmatprep.mubr.bf16.mxu1 %v1686_v11 }
 0x276   :  { %2531 = vmatmul.mubr.bf16.vlgmr.msra.gmra.mxu1 %v5662_v13  ;;  %2574 = vmatmul.mubr.bf16.vlgmr.msra.gmra.mxu0 %v5651_v18  ;;  %v5113_v18 = vld [vmem:[#allocation11 + $0xa4] ss:$16 sps:$4 sm:$0xff]  }
 0x277   :  { %2585 = vmatpush1.bf16.msra.mxu1 %v5057_v12  ;;  %2616 = vmatprep.mubr.bf16.mxu1 %v1686_v11  ;;  %v5144_v11 = vld [vmem:[#allocation11 + $0x140] ss:$16 sps:$4 sm:$0xff]   ;;  %v5149_v12 = vld [vmem:[#allocation11 + $0x124] ss:$16 sps:$4 sm:$0xff]  }
 0x278   :  { %2586 = vmatprep.subr.bf16.mxu1 %v5062_v14  ;;  %3462 = vmatpush1.bf16.msra.mxu0 %v5105_v21  ;;  %v5147_v14 = vld [vmem:[#allocation11 + $0x120] ss:$16 sps:$4 sm:$0xff]   ;;  %v5158_v21 = vld [vmem:[#allocation11 + $0xec] ss:$16 sps:$4 sm:$0xff]  }
 0x279   :  { %3463 = vmatprep.subr.bf16.mxu0 %v5110_v23  ;;  %v5165_v23 = vld [vmem:[#allocation11 + $0x2a0] ss:$16 sps:$4 sm:$0xff]  }
 0x27b   :  { %2587 = vmatpush1.bf16.msra.mxu1 %v5060_v15  ;;  %v5152_v15 = vld [vmem:[#allocation11 + $0x104] ss:$16 sps:$4 sm:$0xff]  }
 0x27c   :  { %2588 = vmatprep.subr.bf16.mxu1 %v5065_v16  ;;  %3464 = vmatpush1.bf16.msra.mxu0 %v5108_v25  ;;  %v5150_v16 = vld [vmem:[#allocation11 + $0x100] ss:$16 sps:$4 sm:$0xff]  }
 0x27d   :  { %3465 = vmatprep.subr.bf16.mxu0 %v5113_v18  ;;  %v5171_v25 = vld [vmem:[#allocation11 + $0x280] ss:$16 sps:$4 sm:$0xff]  }
 0x27e   :  { %v5177_v18 = vld [vmem:[#allocation11 + $0x260] ss:$16 sps:$4 sm:$0xff]  }
 0x27f   :  { %2589 = vmatpush1.bf16.msra.mxu1 %v5063_v17  ;;  %v5153_v17 = vld [vmem:[#allocation11 + $0x2e0] ss:$16 sps:$4 sm:$0xff]  }
 0x280   :  { %2590 = vmatprep.subr.bf16.mxu1 %v5068_v20  ;;  %3466 = vmatpush1.bf16.msra.mxu0 %v5111_v28  ;;  %v5155_v20 = vld [vmem:[#allocation11 + $0x2e4] ss:$16 sps:$4 sm:$0xff]   ;;  %v5183_v28 = vld [vmem:[#allocation11 + $0x240] ss:$16 sps:$4 sm:$0xff]  }
 0x281   :  { %3467 = vmatprep.subr.bf16.mxu0 %v5116_v30  ;;  %v5189_v30 = vld [vmem:[#allocation11 + $0x220] ss:$16 sps:$4 sm:$0xff]  }
 0x283   :  { %2591 = vmatpush1.bf16.msra.mxu1 %v5066_v24  ;;  %v5167_v24 = vld [vmem:[#allocation11 + $0x2a4] ss:$16 sps:$4 sm:$0xff]  }
 0x284   :  { %2592 = vmatprep.subr.bf16.mxu1 %v5071_v26  ;;  %3468 = vmatpush1.bf16.msra.mxu0 %v5114_v32  ;;  %v5173_v26 = vld [vmem:[#allocation11 + $0x284] ss:$16 sps:$4 sm:$0xff]   ;;  %v5195_v32 = vld [vmem:[#allocation11 + $0x200] ss:$16 sps:$4 sm:$0xff]  }
 0x285   :  { %3469 = vmatprep.subr.bf16.mxu0 %v5119_v34  ;;  %v5201_v34 = vld [vmem:[#allocation11 + $0x3e0] ss:$16 sps:$4 sm:$0xff]  }
 0x287   :  { %2593 = vmatpush1.bf16.msra.mxu1 %v5069_v27  ;;  %v5179_v27 = vld [vmem:[#allocation11 + $0x264] ss:$16 sps:$4 sm:$0xff]  }
 0x288   :  { %2594 = vmatprep.subr.bf16.mxu1 %v5074_v29  ;;  %3470 = vmatpush1.bf16.msra.mxu0 %v5117_v36  ;;  %v5185_v29 = vld [vmem:[#allocation11 + $0x244] ss:$16 sps:$4 sm:$0xff]   ;;  %v5207_v36 = vld [vmem:[#allocation11 + $0x3c0] ss:$16 sps:$4 sm:$0xff]  }
 0x289   :  { %3471 = vmatprep.subr.bf16.mxu0 %v5122_v38  ;;  %v5213_v38 = vld [vmem:[#allocation11 + $0x3a0] ss:$16 sps:$4 sm:$0xff]  }
 0x28b   :  { %2595 = vmatpush1.bf16.msra.mxu1 %v5072_v31  ;;  %v5191_v31 = vld [vmem:[#allocation11 + $0x224] ss:$16 sps:$4 sm:$0xff]  }
 0x28c   :  { %2596 = vmatprep.subr.bf16.mxu1 %v5077_v33  ;;  %3472 = vmatpush1.bf16.msra.mxu0 %v5120_v40  ;;  %v5197_v33 = vld [vmem:[#allocation11 + $0x204] ss:$16 sps:$4 sm:$0xff]   ;;  %v5219_v40 = vld [vmem:[#allocation11 + $0x380] ss:$16 sps:$4 sm:$0xff]  }
 0x28d   :  { %3473 = vmatprep.subr.bf16.mxu0 %v5125_v43  ;;  %v5225_v43 = vld [vmem:[#allocation11 + $0x360] ss:$16 sps:$4 sm:$0xff]  }
 0x28f   :  { %2597 = vmatpush1.bf16.msra.mxu1 %v5075_v35  ;;  %v5203_v35 = vld [vmem:[#allocation11 + $0x3e4] ss:$16 sps:$4 sm:$0xff]  }
 0x290   :  { %2598 = vmatprep.subr.bf16.mxu1 %v5080_v37  ;;  %3474 = vmatpush1.bf16.msra.mxu0 %v5123_v45  ;;  %v5209_v37 = vld [vmem:[#allocation11 + $0x3c4] ss:$16 sps:$4 sm:$0xff]  }
 0x291   :  { %3475 = vmatprep.subr.bf16.mxu0 %v5128_v49  ;;  %v5233_v45 = vld [vmem:[#allocation11 + $0x344] ss:$16 sps:$4 sm:$0xff]  }
 0x292   :  { %v5239_v49 = vld [vmem:[#allocation11 + $0x324] ss:$16 sps:$4 sm:$0xff]  }
 0x293   :  { %2599 = vmatpush1.bf16.msra.mxu1 %v5078_v39  ;;  %v5215_v39 = vld [vmem:[#allocation11 + $0x3a4] ss:$16 sps:$4 sm:$0xff]  }
 0x294   :  { %2600 = vmatprep.subr.bf16.mxu1 %v5083_v42  ;;  %3476 = vmatpush1.bf16.msra.mxu0 %v5126_v51  ;;  %v5221_v42 = vld [vmem:[#allocation11 + $0x384] ss:$16 sps:$4 sm:$0xff]  }
 0x295   :  { %3477 = vmatprep.subr.bf16.mxu0 %v5131_v53  ;;  %v5245_v51 = vld [vmem:[#allocation11 + $0x304] ss:$16 sps:$4 sm:$0xff]   ;;  %v5251_v53 = vld [vmem:[#allocation11 + $0x2ec] ss:$16 sps:$4 sm:$0xff]  }
 0x297   :  { %2601 = vmatpush2.bf16.msra.mxu1 %v5081_v44  ;;  %v5227_v44 = vld [vmem:[#allocation11 + $0x364] ss:$16 sps:$4 sm:$0xff]  }
 0x298   :  { %2602 = vmatprep.subr.bf16.mxu1 %v5086_v48  ;;  %3478 = vmatpush2.bf16.msra.mxu0 %v5129_v55  ;;  %v5231_v48 = vld [vmem:[#allocation11 + $0x340] ss:$16 sps:$4 sm:$0xff]  }
 0x299   :  { %3479 = vmatprep.subr.bf16.mxu0 %v5134_v57 }
 0x29b   :  { %2603 = vmatpush2.bf16.msra.mxu1 %v5084_v50  ;;  %v5237_v50 = vld [vmem:[#allocation11 + $0x320] ss:$16 sps:$4 sm:$0xff]  }
 0x29c   :  { %2604 = vmatprep.subr.bf16.mxu1 %v5089_v52  ;;  %3480 = vmatpush2.bf16.msra.mxu0 %v5132_v61  ;;  %v5243_v52 = vld [vmem:[#allocation11 + $0x300] ss:$16 sps:$4 sm:$0xff]  }
 0x29d   :  { %3481 = vmatprep.subr.bf16.mxu0 %v5137_v47 }
 0x29f   :  { %2605 = vmatpush2.bf16.msra.mxu1 %v5087_v54  ;;  %v4399_v54 = vld.sshfl [vmem:[%s5729_s6] sm:$0x33 pattern:$0x75316420] }
 0x2a0   :  { %2606 = vmatprep.subr.bf16.mxu1 %v5092_v56  ;;  %3482 = vmatpush2.bf16.msra.mxu0 %v5135_v62  ;;  %v2640_v56 = vcombine.high %v4399_v54, %v4399_v54 }
 0x2a1   :  { %3483 = vmatprep.subr.bf16.mxu0 %v5140_v59 }
 0x2a2   :  { %v5674_v61 = vrot.slane %v2640_v56, %v5612_v10 }
 0x2a3   :  { %2607 = vmatpush2.bf16.msra.mxu1 %v5090_v60  ;;  %v5671_v60 = vrot.slane %v4399_v54, %v5612_v10 }
 0x2a4   :  { %2608 = vmatprep.subr.bf16.mxu1 %v5095_v46  ;;  %3484 = vmatpush2.bf16.msra.mxu0 %v5138_v1 }
 0x2a5   :  { %3485 = vmatprep.subr.bf16.mxu0 %v5143_v3  ;;  %v2658_v62 = vpack.i.b16 %v5671_v60, %v5671_v60 }
 0x2a7   :  { %2609 = vmatpush2.bf16.msra.mxu1 %v5093_v58  ;;  %v2663_v3 = vrot.slane %v2658_v62, %v5616_v19 }
 0x2a8   :  { %2610 = vmatprep.subr.bf16.mxu1 %v5098_v63  ;;  %3486 = vmatpush2.bf16.msra.mxu0 %v5141_v5  ;;  %v2665_v63 = vpack.i.b16 %v5674_v61, %v5674_v61 }
 0x2a9   :  { %3487 = vmatprep.subr.bf16.mxu0 %v5146_v9 }
 0x2aa   :  { %v2670_v9 = vrot.slane %v2665_v63, %v5616_v19 }
 0x2ab   :  { %2611 = vmatpush2.bf16.msra.mxu1 %v5096_v0 }
 0x2ac   :  { %2612 = vmatprep.subr.bf16.mxu1 %v5101_v2  ;;  %3488 = vmatpush2.bf16.msra.mxu0 %v5144_v11 }
 0x2ad   :  { %3489 = vmatprep.subr.bf16.mxu0 %v5149_v12 }
 0x2af   :  { %2613 = vmatpush2.bf16.msra.mxu1 %v5099_v4 }
 0x2b0   :  { %2614 = vmatprep.subr.bf16.mxu1 %v5104_v7  ;;  %3490 = vmatpush2.bf16.msra.mxu0 %v5147_v14 }
 0x2b1   :  { %3491 = vmatprep.subr.bf16.mxu0 %v5152_v15 }
 0x2b3   :  { %2615 = vmatpush2.bf16.msra.mxu1 %v5102_v8 }
 0x2b4   :  { %3492 = vmatpush2.bf16.msra.mxu0 %v5150_v16  ;;  %3504 = vmatprep.subr.bf16.mxu1 %v5155_v20  ;;  %v5156_v16 = vld [vmem:[#allocation11 + $0xe8] ss:$16 sps:$4 sm:$0xff]   ;;  %v5164_v20 = vld [vmem:[#allocation11 + $0xcc] ss:$16 sps:$4 sm:$0xff]  }
 0x2b5   :  { %3547 = vmatprep.subr.bf16.mxu0 %v5158_v21  ;;  %v5162_v21 = vld [vmem:[#allocation11 + $0xc8] ss:$16 sps:$4 sm:$0xff]  }
 0x2b6   :  { %2617 = vmatmul.mubr.bf16.vlgmr.msra.gmra.mxu1 %v5662_v13  ;;  %v5161_v13 = vld [vmem:[#allocation11 + $0x2c4] ss:$16 sps:$4 sm:$0xff]  }
 0x2b7   :  { %3505 = vmatpush1.bf16.msra.mxu1 %v5153_v17 }
 0x2b8   :  { %3506 = vmatprep.subr.bf16.mxu1 %v5161_v13  ;;  %v5168_v13 = vld [vmem:[#allocation11 + $0xa8] ss:$16 sps:$4 sm:$0xff]  }
 0x2bb   :  { %3507 = vmatpush1.bf16.msra.mxu1 %v5159_v22  ;;  %v5170_v22 = vld [vmem:[#allocation11 + $0xac] ss:$16 sps:$4 sm:$0xff]  }
 0x2bc   :  { %3508 = vmatprep.subr.bf16.mxu1 %v5167_v24  ;;  %v5174_v24 = vld [vmem:[#allocation11 + $0x88] ss:$16 sps:$4 sm:$0xff]  }
 0x2bf   :  { %3509 = vmatpush1.bf16.msra.mxu1 %v5165_v23  ;;  %v5176_v23 = vld [vmem:[#allocation11 + $0x8c] ss:$16 sps:$4 sm:$0xff]  }
 0x2c0   :  { %3510 = vmatprep.subr.bf16.mxu1 %v5173_v26  ;;  %v5180_v26 = vld [vmem:[#allocation11 + $0x68] ss:$16 sps:$4 sm:$0xff]  }
 0x2c3   :  { %3511 = vmatpush1.bf16.msra.mxu1 %v5171_v25  ;;  %v5182_v25 = vld [vmem:[#allocation11 + $0x6c] ss:$16 sps:$4 sm:$0xff]  }
 0x2c4   :  { %3512 = vmatprep.subr.bf16.mxu1 %v5179_v27  ;;  %v5186_v27 = vld [vmem:[#allocation11 + $0x48] ss:$16 sps:$4 sm:$0xff]  }
 0x2c7   :  { %3513 = vmatpush1.bf16.msra.mxu1 %v5177_v18  ;;  %v5188_v18 = vld [vmem:[#allocation11 + $0x4c] ss:$16 sps:$4 sm:$0xff]  }
 0x2c8   :  { %3514 = vmatprep.subr.bf16.mxu1 %v5185_v29  ;;  %v5192_v29 = vld [vmem:[#allocation11 + $0x28] ss:$16 sps:$4 sm:$0xff]  }
 0x2cb   :  { %3515 = vmatpush1.bf16.msra.mxu1 %v5183_v28  ;;  %v5194_v28 = vld [vmem:[#allocation11 + $0x2c] ss:$16 sps:$4 sm:$0xff]  }
 0x2cc   :  { %3516 = vmatprep.subr.bf16.mxu1 %v5191_v31  ;;  %v5198_v31 = vld [vmem:[#allocation11 + $0x8] ss:$16 sps:$4 sm:$0xff]  }
 0x2cf   :  { %3517 = vmatpush1.bf16.msra.mxu1 %v5189_v30  ;;  %v5200_v30 = vld [vmem:[#allocation11 + $0xc] ss:$16 sps:$4 sm:$0xff]  }
 0x2d0   :  { %3518 = vmatprep.subr.bf16.mxu1 %v5197_v33  ;;  %v5204_v33 = vld [vmem:[#allocation11 + $0x1e8] ss:$16 sps:$4 sm:$0xff]  }
 0x2d3   :  { %3519 = vmatpush1.bf16.msra.mxu1 %v5195_v32  ;;  %v5206_v32 = vld [vmem:[#allocation11 + $0x1ec] ss:$16 sps:$4 sm:$0xff]  }
 0x2d4   :  { %3520 = vmatprep.subr.bf16.mxu1 %v5203_v35  ;;  %v5210_v35 = vld [vmem:[#allocation11 + $0x1c8] ss:$16 sps:$4 sm:$0xff]  }
 0x2d7   :  { %3521 = vmatpush2.bf16.msra.mxu1 %v5201_v34  ;;  %v5212_v34 = vld [vmem:[#allocation11 + $0x1cc] ss:$16 sps:$4 sm:$0xff]  }
 0x2d8   :  { %3522 = vmatprep.subr.bf16.mxu1 %v5209_v37  ;;  %v5216_v37 = vld [vmem:[#allocation11 + $0x1a8] ss:$16 sps:$4 sm:$0xff]  }
 0x2db   :  { %3523 = vmatpush2.bf16.msra.mxu1 %v5207_v36  ;;  %v5218_v36 = vld [vmem:[#allocation11 + $0x1ac] ss:$16 sps:$4 sm:$0xff]  }
 0x2dc   :  { %3524 = vmatprep.subr.bf16.mxu1 %v5215_v39  ;;  %v5222_v39 = vld [vmem:[#allocation11 + $0x188] ss:$16 sps:$4 sm:$0xff]  }
 0x2df   :  { %3525 = vmatpush2.bf16.msra.mxu1 %v5213_v38  ;;  %v5224_v38 = vld [vmem:[#allocation11 + $0x18c] ss:$16 sps:$4 sm:$0xff]  }
 0x2e0   :  { %3526 = vmatprep.subr.bf16.mxu1 %v5221_v42  ;;  %v5230_v42 = vld [vmem:[#allocation11 + $0x16c] ss:$16 sps:$4 sm:$0xff]  }
 0x2e3   :  { %3527 = vmatpush2.bf16.msra.mxu1 %v5219_v40 }
 0x2e4   :  { %3528 = vmatprep.subr.bf16.mxu1 %v5227_v44 }
 0x2e7   :  { %3529 = vmatpush2.bf16.msra.mxu1 %v5225_v43  ;;  %v5228_v43 = vld [vmem:[#allocation11 + $0x168] ss:$16 sps:$4 sm:$0xff]  }
 0x2e8   :  { %3530 = vmatprep.subr.bf16.mxu1 %v5233_v45  ;;  %v2655_v45 = vcombine.high %v5671_v60, %v5671_v60 }
 0x2ea   :  { %v2672_v54 = vpack.i.b16 %v2655_v45, %v2655_v45  ;;  %v5285_v45 = vld [vmem:[#allocation11 + $0x368] ss:$16 sps:$4 sm:$0xff]  }
 0x2eb   :  { %3531 = vmatpush2.bf16.msra.mxu1 %v5231_v48  ;;  %v5236_v48 = vld [vmem:[#allocation11 + $0x14c] ss:$16 sps:$4 sm:$0xff]  }
 0x2ec   :  { %3532 = vmatprep.subr.bf16.mxu1 %v5239_v49  ;;  %v2656_v49 = vcombine.high %v5674_v61, %v5674_v61  ;;  %v2677_v60 = vrot.slane %v2672_v54, %v5616_v19  ;;  %v5248_v61 = vld [vmem:[#allocation11 + $0x10c] ss:$16 sps:$4 sm:$0xff]  }
 0x2ed   :  { %v5305_v54 = vld [vmem:[#allocation13 + $0x58] sm:$0xff]  }
 0x2ee   :  { %v2679_v56 = vpack.i.b16 %v2656_v49, %v2656_v49  ;;  %v5288_v49 = vld [vmem:[#allocation11 + $0x348] ss:$16 sps:$4 sm:$0xff]  }
 0x2ef   :  { %3533 = vmatpush2.bf16.msra.mxu1 %v5237_v50 }
 0x2f0   :  { %3534 = vmatprep.subr.bf16.mxu1 %v5245_v51  ;;  %v5234_v51 = vld [vmem:[#allocation11 + $0x148] ss:$16 sps:$4 sm:$0xff]  }
 0x2f3   :  { %3535 = vmatpush2.bf16.msra.mxu1 %v5243_v52 }
 0x2f4   :  { %3590 = vmatprep.subr.bf16.mxu1 %v5251_v53 }
 0x2f6   :  { %v2489_v55 = vpop.f32.mrf.mxu0 }
 0x2f8   :  { %v2491_v57 = vpop.f32.mrf.mxu0 }
 0x2fa   :  { %v2493_v47 = vpop.f32.mrf.mxu0 }
 0x2fc   :  { %v2495_v2 = vpop.f32.mrf.mxu0 }
 0x336   :  { %v2532_v46 = vpop.f32.mrf.mxu1  ;;  %v2575_v40 = vpop.f32.mrf.mxu0 }
 0x337   :  { %v2533_v0 = vadd.f32 %v2532_v46, %v2489_v55  ;;  %v5242_v55 = vld [vmem:[#allocation11 + $0x12c] ss:$16 sps:$4 sm:$0xff]  }
 0x338   :  { %v2534_v58 = vpop.f32.mrf.mxu1  ;;  %v2577_v44 = vpop.f32.mrf.mxu0 }
 0x339   :  { %v2535_v5 = vadd.f32 %v2534_v58, %v2491_v57  ;;  %v5240_v58 = vld [vmem:[#allocation11 + $0x128] ss:$16 sps:$4 sm:$0xff]  }
 0x33a   :  { %v2536_v59 = vpop.f32.mrf.mxu1  ;;  %v2579_v52 = vpop.f32.mrf.mxu0 }
 0x33b   :  { %v2537_v1 = vadd.f32 %v2536_v59, %v2493_v47 }
 0x33c   :  { %v2538_v4 = vpop.f32.mrf.mxu1  ;;  %v2581_v62 = vpop.f32.mrf.mxu0 }
 0x33d   :  { %v2627_v7 = vpack.c.bf16 %v2537_v1, %v2533_v0  ;;  %v2539_v8 = vadd.f32 %v2538_v4, %v2495_v2  ;;  %v2684_v2 = vrot.slane %v2679_v56, %v5616_v19  ;;  %v5246_v4 = vld [vmem:[#allocation11 + $0x108] ss:$16 sps:$4 sm:$0xff]   ;;  %v5307_v56 = vld [vmem:[#allocation13 + $0x50] sm:$0xff]  }
 0x33f   :  { %v2628_v11 = vpack.c.bf16 %v2539_v8, %v2535_v5  ;;  %v2685_v12 = vadd.bf16 %v2663_v3, %v2627_v7 }
 0x341   :  { %v2686_v14 = vadd.bf16 %v2670_v9, %v2628_v11  ;;  %v5684_v17 = vmax.bf16 %v5513_v41, %v2685_v12  ;;  %v5249_v9 = vld [vmem:[#allocation11 + $0x2e8] ss:$16 sps:$4 sm:$0xff]   ;;  %v5254_v12 = vld [vmem:[#allocation11 + $0x2cc] ss:$16 sps:$4 sm:$0xff]  }
 0x343   :  { %v2690_v15 = vmax.bf16 %v5513_v41, %v2686_v14  ;;  %v5252_v14 = vld [vmem:[#allocation11 + $0x2c8] ss:$16 sps:$4 sm:$0xff]  }
 0x345   :  { %3493 = vmatprep.mubr.bf16.mxu0 %v2690_v15 }
 0x346   :  { %3494 = vmatmul.mubr.bf16.vlgmr.msra.gmra.mxu0 %v5684_v17 }
 0x347   :  { %3548 = vmatpush1.bf16.msra.mxu0 %v5156_v16  ;;  %3579 = vmatprep.mubr.bf16.mxu0 %v2690_v15  ;;  %v5257_v15 = vld [vmem:[#allocation11 + $0x2ac] ss:$16 sps:$4 sm:$0xff]   ;;  %v5255_v16 = vld [vmem:[#allocation11 + $0x2a8] ss:$16 sps:$4 sm:$0xff]  }
 0x348   :  { %3549 = vmatprep.subr.bf16.mxu0 %v5164_v20  ;;  %v5260_v20 = vld [vmem:[#allocation11 + $0x28c] ss:$16 sps:$4 sm:$0xff]  }
 0x34b   :  { %3550 = vmatpush1.bf16.msra.mxu0 %v5162_v21  ;;  %v5297_v21 = vld [vmem:[#allocation13 + $0x78] sm:$0xff]  }
 0x34c   :  { %3551 = vmatprep.subr.bf16.mxu0 %v5170_v22  ;;  %v5298_v22 = vld [vmem:[#allocation13 + $0x38] sm:$0xff]  }
 0x34f   :  { %3552 = vmatpush1.bf16.msra.mxu0 %v5168_v13  ;;  %v5299_v13 = vld [vmem:[#allocation13 + $0x70] sm:$0xff]  }
 0x350   :  { %3553 = vmatprep.subr.bf16.mxu0 %v5176_v23  ;;  %v5258_v23 = vld [vmem:[#allocation11 + $0x288] ss:$16 sps:$4 sm:$0xff]  }
 0x353   :  { %3554 = vmatpush1.bf16.msra.mxu0 %v5174_v24  ;;  %v5300_v24 = vld [vmem:[#allocation13 + $0x30] sm:$0xff]  }
 0x354   :  { %3555 = vmatprep.subr.bf16.mxu0 %v5182_v25  ;;  %v5263_v25 = vld [vmem:[#allocation11 + $0x26c] ss:$16 sps:$4 sm:$0xff]  }
 0x357   :  { %3556 = vmatpush1.bf16.msra.mxu0 %v5180_v26  ;;  %v5261_v26 = vld [vmem:[#allocation11 + $0x268] ss:$16 sps:$4 sm:$0xff]  }
 0x358   :  { %3557 = vmatprep.subr.bf16.mxu0 %v5188_v18  ;;  %v5302_v18 = vld [vmem:[#allocation13 + $0x28] sm:$0xff]  }
 0x35b   :  { %3558 = vmatpush1.bf16.msra.mxu0 %v5186_v27  ;;  %v5266_v27 = vld [vmem:[#allocation11 + $0x24c] ss:$16 sps:$4 sm:$0xff]  }
 0x35c   :  { %3559 = vmatprep.subr.bf16.mxu0 %v5194_v28  ;;  %v5303_v28 = vld [vmem:[#allocation13 + $0x60] sm:$0xff]  }
 0x35f   :  { %3560 = vmatpush1.bf16.msra.mxu0 %v5192_v29  ;;  %v5264_v29 = vld [vmem:[#allocation11 + $0x248] ss:$16 sps:$4 sm:$0xff]  }
 0x360   :  { %3561 = vmatprep.subr.bf16.mxu0 %v5200_v30  ;;  %v5304_v30 = vld [vmem:[#allocation13 + $0x20] sm:$0xff]  }
 0x363   :  { %3562 = vmatpush1.bf16.msra.mxu0 %v5198_v31  ;;  %v5269_v31 = vld [vmem:[#allocation11 + $0x22c] ss:$16 sps:$4 sm:$0xff]  }
 0x364   :  { %3563 = vmatprep.subr.bf16.mxu0 %v5206_v32  ;;  %v5267_v32 = vld [vmem:[#allocation11 + $0x228] ss:$16 sps:$4 sm:$0xff]  }
 0x367   :  { %3564 = vmatpush2.bf16.msra.mxu0 %v5204_v33  ;;  %v5272_v33 = vld [vmem:[#allocation11 + $0x20c] ss:$16 sps:$4 sm:$0xff]  }
 0x368   :  { %3565 = vmatprep.subr.bf16.mxu0 %v5212_v34  ;;  %v5270_v34 = vld [vmem:[#allocation11 + $0x208] ss:$16 sps:$4 sm:$0xff]  }
 0x36b   :  { %3566 = vmatpush2.bf16.msra.mxu0 %v5210_v35  ;;  %v5275_v35 = vld [vmem:[#allocation11 + $0x3ec] ss:$16 sps:$4 sm:$0xff]  }
 0x36c   :  { %3567 = vmatprep.subr.bf16.mxu0 %v5218_v36  ;;  %v5273_v36 = vld [vmem:[#allocation11 + $0x3e8] ss:$16 sps:$4 sm:$0xff]  }
 0x36f   :  { %3568 = vmatpush2.bf16.msra.mxu0 %v5216_v37  ;;  %v5278_v37 = vld [vmem:[#allocation11 + $0x3cc] ss:$16 sps:$4 sm:$0xff]  }
 0x370   :  { %3569 = vmatprep.subr.bf16.mxu0 %v5224_v38  ;;  %v5276_v38 = vld [vmem:[#allocation11 + $0x3c8] ss:$16 sps:$4 sm:$0xff]  }
 0x373   :  { %3570 = vmatpush2.bf16.msra.mxu0 %v5222_v39  ;;  %v5281_v39 = vld [vmem:[#allocation11 + $0x3ac] ss:$16 sps:$4 sm:$0xff]  }
 0x374   :  { %3571 = vmatprep.subr.bf16.mxu0 %v5230_v42  ;;  %v5284_v42 = vld [vmem:[#allocation11 + $0x38c] ss:$16 sps:$4 sm:$0xff]  }
 0x376   :  { %v2618_v50 = vpop.f32.mrf.mxu1 }
 0x377   :  { %3572 = vmatpush2.bf16.msra.mxu0 %v5228_v43  ;;  %v2619_v46 = vadd.f32 %v2618_v50, %v2575_v40  ;;  %v5279_v40 = vld [vmem:[#allocation11 + $0x3a8] ss:$16 sps:$4 sm:$0xff]   ;;  %v5293_v50 = vld [vmem:[#allocation11 + $0x32c] ss:$16 sps:$4 sm:$0xff]  }
 0x378   :  { %v2620_v53 = vpop.f32.mrf.mxu1  ;;  %3573 = vmatprep.subr.bf16.mxu0 %v5236_v48  ;;  %v5282_v43 = vld [vmem:[#allocation11 + $0x388] ss:$16 sps:$4 sm:$0xff]   ;;  %v5290_v48 = vld [vmem:[#allocation11 + $0x34c] ss:$16 sps:$4 sm:$0xff]  }
 0x379   :  { %v2621_v59 = vadd.f32 %v2620_v53, %v2577_v44  ;;  %v5287_v44 = vld [vmem:[#allocation11 + $0x36c] ss:$16 sps:$4 sm:$0xff]   ;;  %v5294_v53 = vld [vmem:[#allocation11 + $0x308] ss:$16 sps:$4 sm:$0xff]  }
 0x37a   :  { %v2622_v57 = vpop.f32.mrf.mxu1 }
 0x37b   :  { %v2623_v47 = vadd.f32 %v2622_v57, %v2579_v52  ;;  %3574 = vmatpush2.bf16.msra.mxu0 %v5234_v51  ;;  %v5291_v51 = vld [vmem:[#allocation11 + $0x328] ss:$16 sps:$4 sm:$0xff]   ;;  %v5296_v52 = vld [vmem:[#allocation11 + $0x30c] ss:$16 sps:$4 sm:$0xff]   ;;  %v5308_v57 = vld [vmem:[#allocation13 + $0x10] sm:$0xff]  }
 0x37c   :  { %v2624_v63 = vpop.f32.mrf.mxu1  ;;  %3575 = vmatprep.subr.bf16.mxu0 %v5242_v55  ;;  %v5306_v55 = vld [vmem:[#allocation13 + $0x18] sm:$0xff]  }
 0x37d   :  { %v2629_v0 = vpack.c.bf16 %v2623_v47, %v2619_v46  ;;  %v2625_v1 = vadd.f32 %v2624_v63, %v2581_v62  ;;  %v5309_v46 = vld [vmem:[#allocation13 + $0x48] sm:$0xff]   ;;  %v5312_v62 = vld [vmem:[#allocation13] sm:$0xff]   ;;  %v5314_v63 = vld [vmem:[#allocation13 + $0xb8] sm:$0xff]  }
 0x37e   :  { %v5310_v47 = vld [vmem:[#allocation13 + $0x8] sm:$0xff]  }
 0x37f   :  { %v2630_v3 = vpack.c.bf16 %v2625_v1, %v2621_v59  ;;  %3576 = vmatpush2.bf16.msra.mxu0 %v5240_v58  ;;  %v2687_v5 = vadd.bf16 %v2677_v60, %v2629_v0  ;;  %v5311_v58 = vld [vmem:[#allocation13 + $0x40] sm:$0xff]   ;;  %v5313_v60 = vld [vmem:[#allocation13 + $0xf8] sm:$0xff]   ;;  %v5316_v59 = vld [vmem:[#allocation13 + $0xb0] sm:$0xff]  }
 0x380   :  { %3577 = vmatprep.subr.bf16.mxu0 %v5248_v61  ;;  %v5315_v61 = vld [vmem:[#allocation13 + $0xf0] sm:$0xff]   ;;  %v5317_v0 = vld [vmem:[#allocation13 + $0xe8] sm:$0xff]  }
 0x381   :  { %v2688_v7 = vadd.bf16 %v2684_v2, %v2630_v3  ;;  %v5695_v11 = vmax.bf16 %v5513_v41, %v2687_v5  ;;  %v5318_v1 = vld [vmem:[#allocation13 + $0xa8] sm:$0xff]   ;;  %v5319_v2 = vld [vmem:[#allocation13 + $0xe0] sm:$0xff]   ;;  %v5322_v5 = vld [vmem:[#allocation13 + $0x98] sm:$0xff]  }
 0x382   :  { %v5320_v3 = vld [vmem:[#allocation13 + $0xa0] sm:$0xff]  }
 0x383   :  { %3578 = vmatpush2.bf16.msra.mxu0 %v5246_v4  ;;  %v2692_v8 = vmax.bf16 %v5513_v41, %v2688_v7  ;;  %v5321_v4 = vld [vmem:[#allocation13 + $0xd8] sm:$0xff]   ;;  %v5323_v7 = vld [vmem:[#allocation13 + $0xd0] sm:$0xff]  }
 0x384   :  { %4562 = vmatprep.subr.bf16.mxu0 %v5297_v21 }
 0x385   :  { %3536 = vmatprep.mubr.bf16.mxu1 %v2692_v8 }
 0x386   :  { %3537 = vmatmul.mubr.bf16.vlgmr.msra.gmra.mxu1 %v5695_v11  ;;  %3580 = vmatmul.mubr.bf16.vlgmr.msra.gmra.mxu0 %v5684_v17  ;;  %v5301_v17 = vld [vmem:[#allocation13 + $0x68] sm:$0xff]  }
 0x387   :  { %3591 = vmatpush1.bf16.msra.mxu1 %v5249_v9  ;;  %3622 = vmatprep.mubr.bf16.mxu1 %v2692_v8  ;;  %v5324_v8 = vld [vmem:[#allocation13 + $0x90] sm:$0xff]   ;;  %v5325_v9 = vld [vmem:[#allocation13 + $0xc8] sm:$0xff]  }
 0x388   :  { %3592 = vmatprep.subr.bf16.mxu1 %v5254_v12  ;;  %4563 = vmatpush3.bf16.msra.mxu0 %v5298_v22  ;;  %v5327_v12 = vld [vmem:[#allocation13 + $0xc0] sm:$0xff]  }
 0x389   :  { %4564 = vmatprep.subr.bf16.mxu0 %v5299_v13 }
 0x38b   :  { %3593 = vmatpush1.bf16.msra.mxu1 %v5252_v14  ;;  %v5328_v14 = vld [vmem:[#allocation13 + $0x80] sm:$0xff]  }
 0x38c   :  { %3594 = vmatprep.subr.bf16.mxu1 %v5257_v15  ;;  %4565 = vmatpush3.bf16.msra.mxu0 %v5300_v24  ;;  %v4528_v15 = vld.sshfl [vmem:[%s5731_s8] sm:$0x33 pattern:$0x75316420] }
 0x38d   :  { %4566 = vmatprep.subr.bf16.mxu0 %v5301_v17  ;;  %v3653_v22 = vrot.slane %v4528_v15, %v5612_v10 }
 0x38f   :  { %3595 = vmatpush1.bf16.msra.mxu1 %v5255_v16  ;;  %v3664_v17 = vpack.i.b16 %v3653_v22, %v3653_v22 }
 0x390   :  { %3596 = vmatprep.subr.bf16.mxu1 %v5260_v20  ;;  %4567 = vmatpush3.bf16.msra.mxu0 %v5302_v18  ;;  %v3646_v20 = vcombine.high %v4528_v15, %v4528_v15 }
 0x391   :  { %4568 = vmatprep.subr.bf16.mxu0 %v5303_v28 }
 0x392   :  { %v3660_v13 = vrot.slane %v3646_v20, %v5612_v10 }
 0x393   :  { %3597 = vmatpush1.bf16.msra.mxu1 %v5258_v23 }
 0x394   :  { %3598 = vmatprep.subr.bf16.mxu1 %v5263_v25  ;;  %4569 = vmatpush3.bf16.msra.mxu0 %v5304_v30  ;;  %v3669_v30 = vrot.slane %v3664_v17, %v5616_v19 }
 0x395   :  { %4570 = vmatprep.subr.bf16.mxu0 %v5305_v54 }
 0x397   :  { %3599 = vmatpush1.bf16.msra.mxu1 %v5261_v26  ;;  %v3671_v26 = vpack.i.b16 %v3660_v13, %v3660_v13 }
 0x398   :  { %3600 = vmatprep.subr.bf16.mxu1 %v5266_v27  ;;  %4571 = vmatpush3.bf16.msra.mxu0 %v5306_v55 }
 0x399   :  { %4572 = vmatprep.subr.bf16.mxu0 %v5307_v56 }
 0x39b   :  { %3601 = vmatpush1.bf16.msra.mxu1 %v5264_v29 }
 0x39c   :  { %3602 = vmatprep.subr.bf16.mxu1 %v5269_v31  ;;  %4573 = vmatpush3.bf16.msra.mxu0 %v5308_v57 }
 0x39d   :  { %4574 = vmatprep.subr.bf16.mxu0 %v5309_v46 }
 0x39f   :  { %3603 = vmatpush1.bf16.msra.mxu1 %v5267_v32 }
 0x3a0   :  { %3604 = vmatprep.subr.bf16.mxu1 %v5272_v33  ;;  %4575 = vmatpush3.bf16.msra.mxu0 %v5310_v47 }
 0x3a1   :  { %4576 = vmatprep.subr.bf16.mxu0 %v5311_v58 }
 0x3a3   :  { %3605 = vmatpush1.bf16.msra.mxu1 %v5270_v34 }
 0x3a4   :  { %3606 = vmatprep.subr.bf16.mxu1 %v5275_v35  ;;  %4577 = vmatpush3.bf16.msra.mxu0 %v5312_v62  ;;  %v3676_v35 = vrot.slane %v3671_v26, %v5616_v19 }
 0x3a7   :  { %3607 = vmatpush2.bf16.msra.mxu1 %v5273_v36 }
 0x3a8   :  { %3608 = vmatprep.subr.bf16.mxu1 %v5278_v37 }
 0x3ab   :  { %3609 = vmatpush2.bf16.msra.mxu1 %v5276_v38 }
 0x3ac   :  { %3610 = vmatprep.subr.bf16.mxu1 %v5281_v39 }
 0x3af   :  { %3611 = vmatpush2.bf16.msra.mxu1 %v5279_v40 }
 0x3b0   :  { %3612 = vmatprep.subr.bf16.mxu1 %v5284_v42 }
 0x3b3   :  { %3613 = vmatpush2.bf16.msra.mxu1 %v5282_v43  ;;  %v3661_v43 = vcombine.high %v3653_v22, %v3653_v22 }
 0x3b4   :  { %3614 = vmatprep.subr.bf16.mxu1 %v5287_v44  ;;  %v3662_v44 = vcombine.high %v3660_v13, %v3660_v13 }
 0x3b7   :  { %3615 = vmatpush2.bf16.msra.mxu1 %v5285_v45 }
 0x3b8   :  { %3616 = vmatprep.subr.bf16.mxu1 %v5290_v48 }
 0x3bb   :  { %3617 = vmatpush2.bf16.msra.mxu1 %v5288_v49 }
 0x3bc   :  { %3618 = vmatprep.subr.bf16.mxu1 %v5293_v50  ;;  %v3678_v50 = vpack.i.b16 %v3661_v43, %v3661_v43 }
 0x3be   :  { %v3683_v56 = vrot.slane %v3678_v50, %v5616_v19 }
 0x3bf   :  { %3619 = vmatpush2.bf16.msra.mxu1 %v5291_v51  ;;  %v3685_v51 = vpack.i.b16 %v3662_v44, %v3662_v44 }
 0x3c0   :  { %3620 = vmatprep.subr.bf16.mxu1 %v5296_v52 }
 0x3c1   :  { %v3690_v62 = vrot.slane %v3685_v51, %v5616_v19 }
 0x3c3   :  { %3621 = vmatpush2.bf16.msra.mxu1 %v5294_v53 }
 0x3c4   :  { %4584 = vmatprep.subr.bf16.mxu1 %v5313_v60 }
 0x3c6   :  { %3623 = vmatmul.mubr.bf16.vlgmr.msra.gmra.mxu1 %v5695_v11  ;;  %v5326_v11 = vld [vmem:[#allocation13 + $0x88] sm:$0xff]  }
 0x3c7   :  { %4585 = vmatpush3.bf16.msra.mxu1 %v5314_v63 }
 0x3c8   :  { %4586 = vmatprep.subr.bf16.mxu1 %v5315_v61 }
 0x3cb   :  { %4587 = vmatpush3.bf16.msra.mxu1 %v5316_v59 }
 0x3cc   :  { %4588 = vmatprep.subr.bf16.mxu1 %v5317_v0 }
 0x3cf   :  { %4589 = vmatpush3.bf16.msra.mxu1 %v5318_v1 }
 0x3d0   :  { %4590 = vmatprep.subr.bf16.mxu1 %v5319_v2 }
 0x3d3   :  { %4591 = vmatpush3.bf16.msra.mxu1 %v5320_v3 }
 0x3d4   :  { %4592 = vmatprep.subr.bf16.mxu1 %v5321_v4  ;;  %v4045_v4 = vand.u32 127, %v632_v6 }
 0x3d6   :  { %vm4046_vm0 = vcmp.ge.s32.totalorder %v4045_v4, 7  ;;  %vm4047_vm1 = vcmp.lt.s32.totalorder %v4045_v4, 14 }
 0x3d7   :  { %4593 = vmatpush3.bf16.msra.mxu1 %v5322_v5  ;;  %vm4048_vm2 = vmand %vm4046_vm0, %vm4047_vm1 }
 0x3d8   :  { %4594 = vmatprep.subr.bf16.mxu1 %v5323_v7  ;;  %v4529_v7 = vld [vmem:[%s5733_s10] ss:$0 sm:$0xff]  ;;  %s5469_s10 = scalar_lea.vmem %s4061_s19, 256 }
 0x3d9   :  { %p5470_p7 = scmp.ne.s32.totalorder %s4061_s19, %s5469_s10  ;;  %p5475_p9 = scmp.lt.s32.totalorder %s5469_s10, %s5469_s10 }
 0x3db   :  { %4595 = vmatpush3.bf16.msra.mxu1 %v5324_v8  ;;  %p5476_p10 = por %p5475_p9, %p5474_p8 }
 0x3dc   :  { %4596 = vmatprep.subr.bf16.mxu1 %v5325_v9 }
 0x3dd   :  { %p5477_p11 = pnand %p5476_p10, %p5470_p7 }
 0x3df   :  { %4597 = vmatpush3.bf16.msra.mxu1 %v5326_v11 }
 0x3e0   :  { %4598 = vmatprep.subr.bf16.mxu1 %v5327_v12 }
 0x3e3   :  { %4599 = vmatpush3.bf16.msra.mxu1 %v5328_v14 }
 0x406   :  { %v3495_v16 = vpop.f32.mrf.mxu0 }
 0x408   :  { %v3497_v21 = vpop.f32.mrf.mxu0 }
 0x40a   :  { %v3499_v24 = vpop.f32.mrf.mxu0 }
 0x40c   :  { %v3501_v29 = vpop.f32.mrf.mxu0 }
 0x446   :  { %v3538_v23 = vpop.f32.mrf.mxu1  ;;  %v3581_v40 = vpop.f32.mrf.mxu0 }
 0x447   :  { %v3539_v27 = vadd.f32 %v3538_v23, %v3495_v16 }
 0x448   :  { %v3540_v25 = vpop.f32.mrf.mxu1  ;;  %v3583_v42 = vpop.f32.mrf.mxu0 }
 0x449   :  { %v3541_v32 = vadd.f32 %v3540_v25, %v3497_v21 }
 0x44a   :  { %v3542_v18 = vpop.f32.mrf.mxu1  ;;  %v3585_v48 = vpop.f32.mrf.mxu0 }
 0x44b   :  { %v3543_v28 = vadd.f32 %v3542_v18, %v3499_v24 }
 0x44c   :  { %v3544_v31 = vpop.f32.mrf.mxu1  ;;  %v3587_v55 = vpop.f32.mrf.mxu0 }
 0x44d   :  { %v3633_v33 = vpack.c.bf16 %v3543_v28, %v3539_v27  ;;  %v3545_v34 = vadd.f32 %v3544_v31, %v3501_v29 }
 0x44f   :  { %v3634_v36 = vpack.c.bf16 %v3545_v34, %v3541_v32  ;;  %v3691_v37 = vadd.bf16 %v3669_v30, %v3633_v33 }
 0x451   :  { %v3692_v10 = vadd.bf16 %v3676_v35, %v3634_v36  ;;  %v3695_v39 = vmax.bf16 %v5513_v41, %v3691_v37 }
 0x453   :  { %v3696_v38 = vmax.bf16 %v5513_v41, %v3692_v10 }
 0x455   :  { %3994 = vmatprep.mubr.bf16.mxu0 %v3696_v38 }
 0x456   :  { %3995 = vmatmul.mubr.bf16.vlgmr.msra.gmra.mxu0 %v3695_v39 }
 0x486   :  { %v3624_v45 = vpop.f32.mrf.mxu1 }
 0x487   :  { %v3625_v53 = vadd.f32 %v3624_v45, %v3581_v40 }
 0x488   :  { %v3626_v49 = vpop.f32.mrf.mxu1 }
 0x489   :  { %v3627_v46 = vadd.f32 %v3626_v49, %v3583_v42 }
 0x48a   :  { %v3628_v52 = vpop.f32.mrf.mxu1 }
 0x48b   :  { %v3629_v54 = vadd.f32 %v3628_v52, %v3585_v48 }
 0x48c   :  { %v3630_v57 = vpop.f32.mrf.mxu1 }
 0x48d   :  { %v3635_v47 = vpack.c.bf16 %v3629_v54, %v3625_v53  ;;  %v3631_v58 = vadd.f32 %v3630_v57, %v3587_v55 }
 0x48f   :  { %v3636_v60 = vpack.c.bf16 %v3631_v58, %v3627_v46  ;;  %v3693_v63 = vadd.bf16 %v3683_v56, %v3635_v47 }
 0x491   :  { %v3694_v61 = vadd.bf16 %v3690_v62, %v3636_v60  ;;  %v3697_v0 = vmax.bf16 %v5513_v41, %v3693_v63 }
 0x493   :  { %v3698_v59 = vmax.bf16 %v5513_v41, %v3694_v61 }
 0x495   :  { %4035 = vmatprep.mubr.bf16.mxu1 %v3698_v59 }
 0x496   :  { %4036 = vmatmul.mubr.bf16.vlgmr.msra.gmra.mxu1 %v3697_v0 }
 0x516   :  { %v4578_v1 = vpop.f32.mrf.mxu0 }
 0x518   :  { %v4579_v2 = vpop.f32.mrf.mxu0 }
 0x519   :  { %v4580_v5 = vadd.f32 %v4579_v2, %v4578_v1 }
 0x51a   :  { %v4581_v3 = vpop.f32.mrf.mxu0 }
 0x51b   :  { %v3997_v11 = vadd.f32 %v4580_v5, %v4529_v7 }
 0x51c   :  { %v4582_v19 = vpop.f32.mrf.mxu0 }
 0x51d   :  { %v4583_v12 = vadd.f32 %v4582_v19, %v4581_v3 }
 0x51f   :  { %v4000_v20 = vadd.f32 %v4583_v12, %v4529_v7 }
 0x556   :  { %v4600_v8 = vpop.f32.mrf.mxu1 }
 0x558   :  { %v4601_v9 = vpop.f32.mrf.mxu1 }
 0x559   :  { %v4602_v14 = vadd.f32 %v4601_v9, %v4600_v8 }
 0x55a   :  { %v4603_v41 = vpop.f32.mrf.mxu1 }
 0x55b   :  { %v4038_v15 = vadd.f32 %v4602_v14, %v3997_v11 }
 0x55c   :  { %v4604_v16 = vpop.f32.mrf.mxu1 }
 0x55d   :  { %v4049_v21 = vmax.f32 %v4038_v15, 0.0001  ;;  %v4605_v6 = vadd.f32 %v4604_v16, %v4603_v41 }
 0x55f   :  { %v4041_v22 = vadd.f32 %v4605_v6, %v4000_v20  ;;  %v4051_v13 = vsel %vm4048_vm2, %v4049_v21, %v4038_v15 }
 0x560   :  { %4053 = vst [vmem:[#allocation14] sm:$0xff] %v4051_v13 }
 0x561   :  { %v4050_v23 = vmax.f32 %v4041_v22, 0.0001 }
 0x563   :  { %v4052_v24 = vsel %vm4048_vm2, %v4050_v23, %v4041_v22 }
 0x564   :  { %4054 = vst [vmem:[#allocation14 + $0x8] sm:$0xff] %v4052_v24 }
 0x565   :  { %5480 = shalt.err (!%p5477_p11)
}
 0x566   :  { %4066 = dma.vmem_to_hbm [thread:$0]  %s4061_s19, 256, %s5734_s11, [#allocation4], %s5505_s3, %s5505_s3, %s5506_s17  }
 0x567   :  { %5497 = dma.done.wait [#allocation4], 256  }
 0x568   :  { %5498 = vsyncadd [#allocation4], 4294967040 }
 0x569   :  { %4070 = vsyncpa [#allocation3], 1 }
 0x56a   :  { %4071 = vsyncpa [#allocation6], 1 }
 0x56b   :  { %4072 = vsyncpa [#allocation9], 1 }
 0x56c   :  { %4073 = vsyncpa [#allocation12], 1 }
 0x56d   :  { %4074 = vsyncpa [#allocation4], 1 }

</bundles_post_ra>
